<compile_context>
chip_gen: v6e
topology: v6e:2x2x1
jax: 0.10.0
libtpu: 0.0.40
codegen_flags: <defaults>
</compile_context>

<pallas_src>
import math

import jax
import jax.numpy as jnp
from jax.experimental import pallas as pl
from jax.experimental.pallas import tpu as pltpu

EPS = 1e-5


# ----------------------------------------------------------------------------- kernel
def _fused_residual_stack_kernel(x_ref, sel_ref, selT_ref, shift_ref,
                                 bn_ref, w_ref, o_ref):
    """One grid step == one residual block; activation layout is (N*H, W*C)."""
    layer = pl.program_id(0)
    M, WC = x_ref.shape                    # M = N*H, WC = W*C (lane-dense)
    C = sel_ref.shape[1]
    W = WC // C
    inv_count = 1.0 / float(M * W)         # 1 / (N*H*W)

    # Seed the resident activation (output) buffer with the input at layer 0.
    @pl.when(layer == 0)
    def _():
        o_ref[...] = x_ref[...]

    x = o_ref[...].astype(jnp.float32)     # block input, carried across layers
    sel = sel_ref[...]                     # (WC, C): lane -> channel collapse
    selT = selT_ref[...]                   # (C, WC): channel -> lane expand
    shift_dn = shift_ref[0, :, :]          # (M, M): row h <- row h-1 (0 at h==0)
    shift_up = shift_ref[1, :, :]          # (M, M): row h <- row h+1 (0 at h==H-1)
    bn = bn_ref[...]                       # (1, 4, C): [gamma1, beta1, gamma2, beta2]

    def bn_relu(v, g_row, b_row):
        # Training-mode BatchNorm2d, single pass: per-channel sum & sum-of-squares,
        # folded into per-lane scale/shift, then fused multiply-add + ReLU.
        col_sum = jnp.sum(v, axis=0, keepdims=True)                 # (1, WC)
        col_sq = jnp.sum(v * v, axis=0, keepdims=True)              # (1, WC)
        ch_sum = jnp.dot(col_sum, sel, preferred_element_type=jnp.float32)   # (1, C)
        ch_sq = jnp.dot(col_sq, sel, preferred_element_type=jnp.float32)     # (1, C)
        mean = ch_sum * inv_count
        var = jnp.maximum(ch_sq * inv_count - mean * mean, 0.0)     # biased var
        scale_c = g_row * jax.lax.rsqrt(var + EPS)                  # (1, C)
        shift_c = b_row - mean * scale_c                            # (1, C)
        scale = jnp.dot(scale_c, selT, preferred_element_type=jnp.float32)   # (1, WC)
        shift = jnp.dot(shift_c, selT, preferred_element_type=jnp.float32)   # (1, WC)
        return jnp.maximum(v * scale + shift, 0.0)

    def conv3x3(v, conv_idx):
        # dh = -1 / 0 / +1 row taps via tiny (M,M) shift matmuls; dw taps and the
        # channel mix are pre-folded into block-banded (WC, WC) matrices, so each
        # tap is one full-width MXU matmul (zero padding along W/H is implicit).
        v_dn = jnp.dot(shift_dn, v, preferred_element_type=jnp.float32)
        v_up = jnp.dot(shift_up, v, preferred_element_type=jnp.float32)
        acc = jnp.dot(v_dn, w_ref[0, 3 * conv_idx + 0, :, :],
                      preferred_element_type=jnp.float32)
        acc = acc + jnp.dot(v, w_ref[0, 3 * conv_idx + 1, :, :],
                            preferred_element_type=jnp.float32)
        acc = acc + jnp.dot(v_up, w_ref[0, 3 * conv_idx + 2, :, :],
                            preferred_element_type=jnp.float32)
        return acc

    t = conv3x3(bn_relu(x, bn[0, 0:1, :], bn[0, 1:2, :]), 0)
    t = conv3x3(bn_relu(t, bn[0, 2:3, :], bn[0, 3:4, :]), 1)
    o_ref[...] = (t + x).astype(o_ref.dtype)


# ----------------------------------------------------------------------------- host-side prep
def _build_banded(w9, W):
    """(9, C, C) conv taps -> (3, W*C, W*C) block-banded matrices, one per dh.

    B_dh[w'*C + ci, w*C + co] = w9[dh*3 + dw, ci, co]  with  w' = w + dw - 1,
    which realises the dw taps + zero padding along W as one matmul in the
    (W*C)-folded lane layout."""
    C = w9.shape[1]
    mats = []
    for dh in range(3):
        b = jnp.zeros((W, C, W, C), jnp.float32)
        for dw in range(3):
            eye = jnp.eye(W, k=1 - dw, dtype=jnp.float32)   # [w', w] = 1 iff w' = w+dw-1
            b = b + jnp.einsum('uw,ij->uiwj', eye,
                               w9[dh * 3 + dw].astype(jnp.float32))
        mats.append(b.reshape(W * C, W * C))
    return jnp.stack(mats)                                   # (3, WC, WC)


def _build_row_shift(N, H):
    """(2, M, M) row-shift matrices (h-1 / h+1 within each image, zero at edges)."""
    M = N * H
    r = jnp.arange(M)
    dn = ((r[:, None] - 1) == r[None, :]) & ((r[:, None] % H) != 0)
    up = ((r[:, None] + 1) == r[None, :]) & ((r[:, None] % H) != (H - 1))
    return jnp.stack([dn, up]).astype(jnp.float32)


def _residual_stack_call(x_fold, sel, selT, shift, bn, wstack):
    M, WC = x_fold.shape
    C = sel.shape[1]
    L = bn.shape[0]
    return pl.pallas_call(
        _fused_residual_stack_kernel,
        out_shape=jax.ShapeDtypeStruct((M, WC), x_fold.dtype),
        grid=(L,),
        in_specs=[
            pl.BlockSpec((M, WC), lambda l: (0, 0)),            # activation input (resident)
            pl.BlockSpec((WC, C), lambda l: (0, 0)),            # lane->channel collapse
            pl.BlockSpec((C, WC), lambda l: (0, 0)),            # channel->lane expand
            pl.BlockSpec((2, M, M), lambda l: (0, 0, 0)),       # row-shift matrices
            pl.BlockSpec((1, 4, C), lambda l: (l, 0, 0)),       # per-layer BN params
            pl.BlockSpec((1, 6, WC, WC), lambda l: (l, 0, 0, 0)),  # per-layer banded conv mats
        ],
        out_specs=pl.BlockSpec((M, WC), lambda l: (0, 0)),      # resident carry / final out
        compiler_params=pltpu.CompilerParams(
            dimension_semantics=("arbitrary",)),                # layers are sequential
    )(x_fold, sel, selT, shift, bn, wstack)


@jax.jit
def cnn_2d_for_comparable_features_pallas(x_nchw, params):
    """Stack of residual_2d_module blocks, fused into a single pallas_call."""
    N, C, H, W = x_nchw.shape
    WC = W * C
    M = N * H
    # NCHW -> NHWC -> fold (W, C) onto the lane dim -> (N*H, W*C).
    x_fold = jnp.transpose(x_nchw, (0, 2, 3, 1)).reshape(M, WC)

    sel = jnp.tile(jnp.eye(C, dtype=jnp.float32), (W, 1))       # (WC, C)
    selT = jnp.transpose(sel)                                   # (C, WC)
    shift = _build_row_shift(N, H)                              # (2, M, M)

    bn = jnp.stack([jnp.concatenate([g1, b1, g2, b2], axis=0).astype(jnp.float32)
                    for (g1, b1, w1, g2, b2, w2) in params])    # (L, 4, C)
    wstack = jnp.stack([jnp.concatenate([_build_banded(w1, W),
                                         _build_banded(w2, W)], axis=0)
                        for (g1, b1, w1, g2, b2, w2) in params])  # (L, 6, WC, WC)

    out = _residual_stack_call(x_fold, sel, selT, shift, bn, wstack)
    return jnp.transpose(out.reshape(N, H, W, C), (0, 3, 1, 2))   # back to NCHW


# ----------------------------------------------------------------------------- params / reference
def init_params(key, ch, num_of_residuals):
    """Deterministic synthetic parameters.

    Conv weights are stored as (9, cin, cout) with tap = dh*3 + dw, i.e.
    w_ours[dh*3+dw, ci, co] == w_torch[co, ci, dh, dw]."""
    params = []
    scale = 1.0 / math.sqrt(9 * ch)
    for _ in range(num_of_residuals):
        key, k0, k1, k2, k3, k4, k5 = jax.random.split(key, 7)
        g1 = jax.random.uniform(k0, (1, ch), jnp.float32, 0.5, 1.5)
        b1 = 0.1 * jax.random.normal(k1, (1, ch), jnp.float32)
        w1 = scale * jax.random.normal(k2, (9, ch, ch), jnp.float32)
        g2 = jax.random.uniform(k3, (1, ch), jnp.float32, 0.5, 1.5)
        b2 = 0.1 * jax.random.normal(k4, (1, ch), jnp.float32)
        w2 = scale * jax.random.normal(k5, (9, ch, ch), jnp.float32)
        params.append((g1, b1, w1, g2, b2, w2))
    return params


def reference_forward(x_nchw, params):
    """Pure-JAX NCHW reference mirroring the PyTorch forward (training-mode BN)."""
    def bn_relu(v, g, b):
        mean = v.mean(axis=(0, 2, 3), keepdims=True)
        var = ((v - mean) ** 2).mean(axis=(0, 2, 3), keepdims=True)
        y = (v - mean) / jnp.sqrt(var + EPS)
        y = y * g.reshape(1, -1, 1, 1) + b.reshape(1, -1, 1, 1)
        return jnp.maximum(y, 0.0)

    def conv(v, w9):
        ci, co = w9.shape[1], w9.shape[2]
        w_oihw = w9.reshape(3, 3, ci, co).transpose(3, 2, 0, 1)  # (co, ci, 3, 3)
        return jax.lax.conv_general_dilated(
            v, w_oihw, window_strides=(1, 1), padding="SAME",
            dimension_numbers=("NCHW", "OIHW", "NCHW"))

    x = x_nchw
    for (g1, b1, w1, g2, b2, w2) in params:
        t = conv(bn_relu(x, g1, b1), w1)
        t = conv(bn_relu(t, g2, b2), w2)
        x = t + x
    return x


if __name__ == "__main__":
    N, CH, H, W = 2, 8, 16, 16      # W*C = 128 -> exactly one lane-width
    NUM_RESIDUALS = 2

    key = jax.random.PRNGKey(0)
    kx, kp = jax.random.split(key)
    x = jax.random.normal(kx, (N, CH, H, W), jnp.float32)  # NCHW like PyTorch
    params = init_params(kp, CH, NUM_RESIDUALS)

    out = cnn_2d_for_comparable_features_pallas(x, params)
    out = jax.block_until_ready(out)

    ref = reference_forward(x, params)
    assert out.shape == x.shape
    if not jnp.allclose(out, ref, rtol=1e-2, atol=1e-2):
        max_err = float(jnp.max(jnp.abs(out - ref)))
        raise AssertionError(f"Pallas output mismatch vs reference, max_err={max_err}")

    print("KERNEL_OK")
</pallas_src>

<mosaic_0001>
module attributes {stable_mosaic.version = 11 : i64} {
  func.func @_fused_residual_stack_kernel(%arg0: i32, %arg1: memref<32x128xf32, #tpu.memory_space<vmem>>, %arg2: memref<128x8xf32, #tpu.memory_space<vmem>>, %arg3: memref<8x128xf32, #tpu.memory_space<vmem>>, %arg4: memref<2x32x32xf32, #tpu.memory_space<vmem>>, %arg5: memref<1x4x8xf32, #tpu.memory_space<vmem>>, %arg6: memref<1x6x128x128xf32, #tpu.memory_space<vmem>>, %arg7: memref<32x128xf32, #tpu.memory_space<vmem>>) attributes {dimension_semantics = [#tpu.dimension_semantics<arbitrary>], iteration_bounds = array<i64: 2>, scalar_prefetch = 0 : i64, scratch_operands = 0 : i64, tpu.core_type = #tpu.core_type<tc>, window_params = [{pipeline_mode = #tpu.pipeline_mode<synchronous>, transform_indices = @transform_0, window_bounds = array<i64: 32, 128>}, {pipeline_mode = #tpu.pipeline_mode<synchronous>, transform_indices = @transform_1, window_bounds = array<i64: 128, 8>}, {pipeline_mode = #tpu.pipeline_mode<synchronous>, transform_indices = @transform_2, window_bounds = array<i64: 8, 128>}, {pipeline_mode = #tpu.pipeline_mode<synchronous>, transform_indices = @transform_3, window_bounds = array<i64: 2, 32, 32>}, {transform_indices = @transform_4, window_bounds = array<i64: 1, 4, 8>}, {transform_indices = @transform_5, window_bounds = array<i64: 1, 6, 128, 128>}, {pipeline_mode = #tpu.pipeline_mode<synchronous>, transform_indices = @transform_6, window_bounds = array<i64: 32, 128>}]} {
    %c0_i32 = arith.constant 0 : i32
    %0 = arith.cmpi eq, %arg0, %c0_i32 : i32
    %1 = arith.extui %0 : i1 to i32
    %c0_i32_0 = arith.constant 0 : i32
    %2 = arith.cmpi ne, %1, %c0_i32_0 : i32
    scf.if %2 {
      %c0_67 = arith.constant 0 : index
      %c0_68 = arith.constant 0 : index
      %105 = vector.load %arg1[%c0_67, %c0_68] : memref<32x128xf32, #tpu.memory_space<vmem>>, vector<32x128xf32>
      %c0_69 = arith.constant 0 : index
      %c0_70 = arith.constant 0 : index
      %106 = vector.load %arg7[%c0_69, %c0_70] : memref<32x128xf32, #tpu.memory_space<vmem>>, vector<32x128xf32>
      tpu.vector_store %arg7[%c0_69, %c0_70], %105 {strides = array<i32>} : memref<32x128xf32, #tpu.memory_space<vmem>>, vector<32x128xf32>,
    } else {
    }
    %c0 = arith.constant 0 : index
    %c0_1 = arith.constant 0 : index
    %3 = vector.load %arg7[%c0, %c0_1] : memref<32x128xf32, #tpu.memory_space<vmem>>, vector<32x128xf32>
    %c0_2 = arith.constant 0 : index
    %c0_3 = arith.constant 0 : index
    %4 = vector.load %arg2[%c0_2, %c0_3] : memref<128x8xf32, #tpu.memory_space<vmem>>, vector<128x8xf32>
    %c0_4 = arith.constant 0 : index
    %c0_5 = arith.constant 0 : index
    %5 = vector.load %arg3[%c0_4, %c0_5] : memref<8x128xf32, #tpu.memory_space<vmem>>, vector<8x128xf32>
    %c0_6 = arith.constant 0 : index
    %c0_7 = arith.constant 0 : index
    %c0_8 = arith.constant 0 : index
    %6 = vector.load %arg4[%c0_6, %c0_7, %c0_8] : memref<2x32x32xf32, #tpu.memory_space<vmem>>, vector<1x32x32xf32>
    %7 = vector.shape_cast %6 : vector<1x32x32xf32> to vector<32x32xf32>
    %c1 = arith.constant 1 : index
    %c0_9 = arith.constant 0 : index
    %c0_10 = arith.constant 0 : index
    %8 = vector.load %arg4[%c1, %c0_9, %c0_10] : memref<2x32x32xf32, #tpu.memory_space<vmem>>, vector<1x32x32xf32>
    %9 = vector.shape_cast %8 : vector<1x32x32xf32> to vector<32x32xf32>
    %c0_11 = arith.constant 0 : index
    %c0_12 = arith.constant 0 : index
    %c0_13 = arith.constant 0 : index
    %10 = vector.load %arg5[%c0_11, %c0_12, %c0_13] : memref<1x4x8xf32, #tpu.memory_space<vmem>>, vector<1x4x8xf32>
    %11 = vector.extract_strided_slice %10 {offsets = [0, 0, 0], sizes = [1, 1, 8], strides = [1, 1, 1]} : vector<1x4x8xf32> to vector<1x1x8xf32>
    %12 = vector.shape_cast %11 : vector<1x1x8xf32> to vector<1x8xf32>
    %13 = vector.extract_strided_slice %10 {offsets = [0, 1, 0], sizes = [1, 1, 8], strides = [1, 1, 1]} : vector<1x4x8xf32> to vector<1x1x8xf32>
    %14 = vector.shape_cast %13 : vector<1x1x8xf32> to vector<1x8xf32>
    %cst = arith.constant dense<0.000000e+00> : vector<128xf32>
    %15 = vector.multi_reduction <add>, %3, %cst [0] : vector<32x128xf32> to vector<128xf32>
    %16 = vector.shape_cast %15 : vector<128xf32> to vector<1x128xf32>
    %17 = arith.mulf %3, %3 : vector<32x128xf32>
    %cst_14 = arith.constant dense<0.000000e+00> : vector<128xf32>
    %18 = vector.multi_reduction <add>, %17, %cst_14 [0] : vector<32x128xf32> to vector<128xf32>
    %19 = vector.shape_cast %18 : vector<128xf32> to vector<1x128xf32>
    %cst_15 = arith.constant dense<0.000000e+00> : vector<1x8xf32>
    %20 = tpu.matmul %16, %4, %cst_15 {dimension_numbers = #tpu.dot_dimension_numbers<[1], [0], [0], [1], [0, 0, 1, 1], [], []>} : vector<1x128xf32>, vector<128x8xf32>, vector<1x8xf32> -> vector<1x8xf32>
    %cst_16 = arith.constant dense<0.000000e+00> : vector<1x8xf32>
    %21 = tpu.matmul %19, %4, %cst_16 {dimension_numbers = #tpu.dot_dimension_numbers<[1], [0], [0], [1], [0, 0, 1, 1], [], []>} : vector<1x128xf32>, vector<128x8xf32>, vector<1x8xf32> -> vector<1x8xf32>
    %cst_17 = arith.constant 0.001953125 : f32
    %22 = vector.broadcast %cst_17 : f32 to vector<1x8xf32>
    %23 = arith.mulf %20, %22 : vector<1x8xf32>
    %cst_18 = arith.constant 0.001953125 : f32
    %24 = vector.broadcast %cst_18 : f32 to vector<1x8xf32>
    %25 = arith.mulf %21, %24 : vector<1x8xf32>
    %26 = arith.mulf %23, %23 : vector<1x8xf32>
    %27 = arith.subf %25, %26 : vector<1x8xf32>
    %cst_19 = arith.constant 0.000000e+00 : f32
    %28 = vector.broadcast %cst_19 : f32 to vector<1x8xf32>
    %29 = arith.maximumf %27, %28 : vector<1x8xf32>
    %cst_20 = arith.constant 9.99999974E-6 : f32
    %30 = vector.broadcast %cst_20 : f32 to vector<1x8xf32>
    %31 = arith.addf %29, %30 : vector<1x8xf32>
    %32 = math.rsqrt %31 : vector<1x8xf32>
    %33 = arith.mulf %12, %32 : vector<1x8xf32>
    %34 = arith.mulf %23, %33 : vector<1x8xf32>
    %35 = arith.subf %14, %34 : vector<1x8xf32>
    %cst_21 = arith.constant dense<0.000000e+00> : vector<1x128xf32>
    %36 = tpu.matmul %33, %5, %cst_21 {dimension_numbers = #tpu.dot_dimension_numbers<[1], [0], [0], [1], [0, 0, 1, 1], [], []>} : vector<1x8xf32>, vector<8x128xf32>, vector<1x128xf32> -> vector<1x128xf32>
    %cst_22 = arith.constant dense<0.000000e+00> : vector<1x128xf32>
    %37 = tpu.matmul %35, %5, %cst_22 {dimension_numbers = #tpu.dot_dimension_numbers<[1], [0], [0], [1], [0, 0, 1, 1], [], []>} : vector<1x8xf32>, vector<8x128xf32>, vector<1x128xf32> -> vector<1x128xf32>
    %38 = vector.broadcast %36 : vector<1x128xf32> to vector<32x128xf32>
    %39 = arith.mulf %3, %38 : vector<32x128xf32>
    %40 = vector.broadcast %37 : vector<1x128xf32> to vector<32x128xf32>
    %41 = arith.addf %39, %40 : vector<32x128xf32>
    %cst_23 = arith.constant 0.000000e+00 : f32
    %42 = vector.broadcast %cst_23 : f32 to vector<32x128xf32>
    %43 = arith.maximumf %41, %42 : vector<32x128xf32>
    %cst_24 = arith.constant dense<0.000000e+00> : vector<32x128xf32>
    %44 = tpu.matmul %7, %43, %cst_24 {dimension_numbers = #tpu.dot_dimension_numbers<[1], [0], [0], [1], [0, 0, 1, 1], [], []>} : vector<32x32xf32>, vector<32x128xf32>, vector<32x128xf32> -> vector<32x128xf32>
    %cst_25 = arith.constant dense<0.000000e+00> : vector<32x128xf32>
    %45 = tpu.matmul %9, %43, %cst_25 {dimension_numbers = #tpu.dot_dimension_numbers<[1], [0], [0], [1], [0, 0, 1, 1], [], []>} : vector<32x32xf32>, vector<32x128xf32>, vector<32x128xf32> -> vector<32x128xf32>
    %c0_26 = arith.constant 0 : index
    %c0_27 = arith.constant 0 : index
    %c0_28 = arith.constant 0 : index
    %c0_29 = arith.constant 0 : index
    %46 = vector.load %arg6[%c0_26, %c0_27, %c0_28, %c0_29] : memref<1x6x128x128xf32, #tpu.memory_space<vmem>>, vector<1x1x128x128xf32>
    %47 = vector.shape_cast %46 : vector<1x1x128x128xf32> to vector<128x128xf32>
    %cst_30 = arith.constant dense<0.000000e+00> : vector<32x128xf32>
    %48 = tpu.matmul %44, %47, %cst_30 {dimension_numbers = #tpu.dot_dimension_numbers<[1], [0], [0], [1], [0, 0, 1, 1], [], []>} : vector<32x128xf32>, vector<128x128xf32>, vector<32x128xf32> -> vector<32x128xf32>
    %c0_31 = arith.constant 0 : index
    %c1_32 = arith.constant 1 : index
    %c0_33 = arith.constant 0 : index
    %c0_34 = arith.constant 0 : index
    %49 = vector.load %arg6[%c0_31, %c1_32, %c0_33, %c0_34] : memref<1x6x128x128xf32, #tpu.memory_space<vmem>>, vector<1x1x128x128xf32>
    %50 = vector.shape_cast %49 : vector<1x1x128x128xf32> to vector<128x128xf32>
    %cst_35 = arith.constant dense<0.000000e+00> : vector<32x128xf32>
    %51 = tpu.matmul %43, %50, %cst_35 {dimension_numbers = #tpu.dot_dimension_numbers<[1], [0], [0], [1], [0, 0, 1, 1], [], []>} : vector<32x128xf32>, vector<128x128xf32>, vector<32x128xf32> -> vector<32x128xf32>
    %52 = arith.addf %48, %51 : vector<32x128xf32>
    %c0_36 = arith.constant 0 : index
    %c2 = arith.constant 2 : index
    %c0_37 = arith.constant 0 : index
    %c0_38 = arith.constant 0 : index
    %53 = vector.load %arg6[%c0_36, %c2, %c0_37, %c0_38] : memref<1x6x128x128xf32, #tpu.memory_space<vmem>>, vector<1x1x128x128xf32>
    %54 = vector.shape_cast %53 : vector<1x1x128x128xf32> to vector<128x128xf32>
    %cst_39 = arith.constant dense<0.000000e+00> : vector<32x128xf32>
    %55 = tpu.matmul %45, %54, %cst_39 {dimension_numbers = #tpu.dot_dimension_numbers<[1], [0], [0], [1], [0, 0, 1, 1], [], []>} : vector<32x128xf32>, vector<128x128xf32>, vector<32x128xf32> -> vector<32x128xf32>
    %56 = arith.addf %52, %55 : vector<32x128xf32>
    %57 = vector.extract_strided_slice %10 {offsets = [0, 2, 0], sizes = [1, 1, 8], strides = [1, 1, 1]} : vector<1x4x8xf32> to vector<1x1x8xf32>
    %58 = vector.shape_cast %57 : vector<1x1x8xf32> to vector<1x8xf32>
    %59 = vector.extract_strided_slice %10 {offsets = [0, 3, 0], sizes = [1, 1, 8], strides = [1, 1, 1]} : vector<1x4x8xf32> to vector<1x1x8xf32>
    %60 = vector.shape_cast %59 : vector<1x1x8xf32> to vector<1x8xf32>
    %cst_40 = arith.constant dense<0.000000e+00> : vector<128xf32>
    %61 = vector.multi_reduction <add>, %56, %cst_40 [0] : vector<32x128xf32> to vector<128xf32>
    %62 = vector.shape_cast %61 : vector<128xf32> to vector<1x128xf32>
    %63 = arith.mulf %56, %56 : vector<32x128xf32>
    %cst_41 = arith.constant dense<0.000000e+00> : vector<128xf32>
    %64 = vector.multi_reduction <add>, %63, %cst_41 [0] : vector<32x128xf32> to vector<128xf32>
    %65 = vector.shape_cast %64 : vector<128xf32> to vector<1x128xf32>
    %cst_42 = arith.constant dense<0.000000e+00> : vector<1x8xf32>
    %66 = tpu.matmul %62, %4, %cst_42 {dimension_numbers = #tpu.dot_dimension_numbers<[1], [0], [0], [1], [0, 0, 1, 1], [], []>} : vector<1x128xf32>, vector<128x8xf32>, vector<1x8xf32> -> vector<1x8xf32>
    %cst_43 = arith.constant dense<0.000000e+00> : vector<1x8xf32>
    %67 = tpu.matmul %65, %4, %cst_43 {dimension_numbers = #tpu.dot_dimension_numbers<[1], [0], [0], [1], [0, 0, 1, 1], [], []>} : vector<1x128xf32>, vector<128x8xf32>, vector<1x8xf32> -> vector<1x8xf32>
    %cst_44 = arith.constant 0.001953125 : f32
    %68 = vector.broadcast %cst_44 : f32 to vector<1x8xf32>
    %69 = arith.mulf %66, %68 : vector<1x8xf32>
    %cst_45 = arith.constant 0.001953125 : f32
    %70 = vector.broadcast %cst_45 : f32 to vector<1x8xf32>
    %71 = arith.mulf %67, %70 : vector<1x8xf32>
    %72 = arith.mulf %69, %69 : vector<1x8xf32>
    %73 = arith.subf %71, %72 : vector<1x8xf32>
    %cst_46 = arith.constant 0.000000e+00 : f32
    %74 = vector.broadcast %cst_46 : f32 to vector<1x8xf32>
    %75 = arith.maximumf %73, %74 : vector<1x8xf32>
    %cst_47 = arith.constant 9.99999974E-6 : f32
    %76 = vector.broadcast %cst_47 : f32 to vector<1x8xf32>
    %77 = arith.addf %75, %76 : vector<1x8xf32>
    %78 = math.rsqrt %77 : vector<1x8xf32>
    %79 = arith.mulf %58, %78 : vector<1x8xf32>
    %80 = arith.mulf %69, %79 : vector<1x8xf32>
    %81 = arith.subf %60, %80 : vector<1x8xf32>
    %cst_48 = arith.constant dense<0.000000e+00> : vector<1x128xf32>
    %82 = tpu.matmul %79, %5, %cst_48 {dimension_numbers = #tpu.dot_dimension_numbers<[1], [0], [0], [1], [0, 0, 1, 1], [], []>} : vector<1x8xf32>, vector<8x128xf32>, vector<1x128xf32> -> vector<1x128xf32>
    %cst_49 = arith.constant dense<0.000000e+00> : vector<1x128xf32>
    %83 = tpu.matmul %81, %5, %cst_49 {dimension_numbers = #tpu.dot_dimension_numbers<[1], [0], [0], [1], [0, 0, 1, 1], [], []>} : vector<1x8xf32>, vector<8x128xf32>, vector<1x128xf32> -> vector<1x128xf32>
    %84 = vector.broadcast %82 : vector<1x128xf32> to vector<32x128xf32>
    %85 = arith.mulf %56, %84 : vector<32x128xf32>
    %86 = vector.broadcast %83 : vector<1x128xf32> to vector<32x128xf32>
    %87 = arith.addf %85, %86 : vector<32x128xf32>
    %cst_50 = arith.constant 0.000000e+00 : f32
    %88 = vector.broadcast %cst_50 : f32 to vector<32x128xf32>
    %89 = arith.maximumf %87, %88 : vector<32x128xf32>
    %cst_51 = arith.constant dense<0.000000e+00> : vector<32x128xf32>
    %90 = tpu.matmul %7, %89, %cst_51 {dimension_numbers = #tpu.dot_dimension_numbers<[1], [0], [0], [1], [0, 0, 1, 1], [], []>} : vector<32x32xf32>, vector<32x128xf32>, vector<32x128xf32> -> vector<32x128xf32>
    %cst_52 = arith.constant dense<0.000000e+00> : vector<32x128xf32>
    %91 = tpu.matmul %9, %89, %cst_52 {dimension_numbers = #tpu.dot_dimension_numbers<[1], [0], [0], [1], [0, 0, 1, 1], [], []>} : vector<32x32xf32>, vector<32x128xf32>, vector<32x128xf32> -> vector<32x128xf32>
    %c0_53 = arith.constant 0 : index
    %c3 = arith.constant 3 : index
    %c0_54 = arith.constant 0 : index
    %c0_55 = arith.constant 0 : index
    %92 = vector.load %arg6[%c0_53, %c3, %c0_54, %c0_55] : memref<1x6x128x128xf32, #tpu.memory_space<vmem>>, vector<1x1x128x128xf32>
    %93 = vector.shape_cast %92 : vector<1x1x128x128xf32> to vector<128x128xf32>
    %cst_56 = arith.constant dense<0.000000e+00> : vector<32x128xf32>
    %94 = tpu.matmul %90, %93, %cst_56 {dimension_numbers = #tpu.dot_dimension_numbers<[1], [0], [0], [1], [0, 0, 1, 1], [], []>} : vector<32x128xf32>, vector<128x128xf32>, vector<32x128xf32> -> vector<32x128xf32>
    %c0_57 = arith.constant 0 : index
    %c4 = arith.constant 4 : index
    %c0_58 = arith.constant 0 : index
    %c0_59 = arith.constant 0 : index
    %95 = vector.load %arg6[%c0_57, %c4, %c0_58, %c0_59] : memref<1x6x128x128xf32, #tpu.memory_space<vmem>>, vector<1x1x128x128xf32>
    %96 = vector.shape_cast %95 : vector<1x1x128x128xf32> to vector<128x128xf32>
    %cst_60 = arith.constant dense<0.000000e+00> : vector<32x128xf32>
    %97 = tpu.matmul %89, %96, %cst_60 {dimension_numbers = #tpu.dot_dimension_numbers<[1], [0], [0], [1], [0, 0, 1, 1], [], []>} : vector<32x128xf32>, vector<128x128xf32>, vector<32x128xf32> -> vector<32x128xf32>
    %98 = arith.addf %94, %97 : vector<32x128xf32>
    %c0_61 = arith.constant 0 : index
    %c5 = arith.constant 5 : index
    %c0_62 = arith.constant 0 : index
    %c0_63 = arith.constant 0 : index
    %99 = vector.load %arg6[%c0_61, %c5, %c0_62, %c0_63] : memref<1x6x128x128xf32, #tpu.memory_space<vmem>>, vector<1x1x128x128xf32>
    %100 = vector.shape_cast %99 : vector<1x1x128x128xf32> to vector<128x128xf32>
    %cst_64 = arith.constant dense<0.000000e+00> : vector<32x128xf32>
    %101 = tpu.matmul %91, %100, %cst_64 {dimension_numbers = #tpu.dot_dimension_numbers<[1], [0], [0], [1], [0, 0, 1, 1], [], []>} : vector<32x128xf32>, vector<128x128xf32>, vector<32x128xf32> -> vector<32x128xf32>
    %102 = arith.addf %98, %101 : vector<32x128xf32>
    %103 = arith.addf %102, %3 : vector<32x128xf32>
    %c0_65 = arith.constant 0 : index
    %c0_66 = arith.constant 0 : index
    %104 = vector.load %arg7[%c0_65, %c0_66] : memref<32x128xf32, #tpu.memory_space<vmem>>, vector<32x128xf32>
    tpu.vector_store %arg7[%c0_65, %c0_66], %103 {strides = array<i32>} : memref<32x128xf32, #tpu.memory_space<vmem>>, vector<32x128xf32>,
    return
  }
  func.func @transform_0(%arg0: i32) -> (i32, i32) {
    %c0_i32 = arith.constant 0 : i32
    %c0_i32_0 = arith.constant 0 : i32
    %c0_i32_1 = arith.constant 0 : i32
    return %c0_i32, %c0_i32_0 : i32, i32
  }
  func.func @transform_1(%arg0: i32) -> (i32, i32) {
    %c0_i32 = arith.constant 0 : i32
    %c0_i32_0 = arith.constant 0 : i32
    %c0_i32_1 = arith.constant 0 : i32
    return %c0_i32, %c0_i32_0 : i32, i32
  }
  func.func @transform_2(%arg0: i32) -> (i32, i32) {
    %c0_i32 = arith.constant 0 : i32
    %c0_i32_0 = arith.constant 0 : i32
    %c0_i32_1 = arith.constant 0 : i32
    return %c0_i32, %c0_i32_0 : i32, i32
  }
  func.func @transform_3(%arg0: i32) -> (i32, i32, i32) {
    %c0_i32 = arith.constant 0 : i32
    %c0_i32_0 = arith.constant 0 : i32
    %c0_i32_1 = arith.constant 0 : i32
    %c0_i32_2 = arith.constant 0 : i32
    return %c0_i32, %c0_i32_0, %c0_i32_1 : i32, i32, i32
  }
  func.func @transform_4(%arg0: i32) -> (i32, i32, i32) {
    %c0_i32 = arith.constant 0 : i32
    %c0_i32_0 = arith.constant 0 : i32
    %c0_i32_1 = arith.constant 0 : i32
    return %arg0, %c0_i32, %c0_i32_0 : i32, i32, i32
  }
  func.func @transform_5(%arg0: i32) -> (i32, i32, i32, i32) {
    %c0_i32 = arith.constant 0 : i32
    %c0_i32_0 = arith.constant 0 : i32
    %c0_i32_1 = arith.constant 0 : i32
    %c0_i32_2 = arith.constant 0 : i32
    return %arg0, %c0_i32, %c0_i32_0, %c0_i32_1 : i32, i32, i32, i32
  }
  func.func @transform_6(%arg0: i32) -> (i32, i32) {
    %c0_i32 = arith.constant 0 : i32
    %c0_i32_0 = arith.constant 0 : i32
    %c0_i32_1 = arith.constant 0 : i32
    return %c0_i32, %c0_i32_0 : i32, i32
  }
}

</mosaic_0001>

<bundles_post_ra>
// kernel: tile.9
= control target key start
LH: loop header
LB: loop body
LE: loop exit
PB: predicated region body
PF: predicated region fallthrough
CT: control target
= control target key end

     0   :  { %vm6_vm0 = vcmask 1043458   ;;  %vm10_vm1 = vcmask 1045508   ;;  %vm14_vm2 = vcmask 1047558   ;;  %s19_s6 = smov 3  ;;  %s22_s7 = smov 12  ;;  %vm16_vm3 = vcmask 64512   ;;  %s736_s0 = inlined_call_operand.vmem [shape: f32[16,8,8], index: 0, kind: input, shape index: {}]   ;;  %s737_s1 = inlined_call_operand.vmem [shape: f32[128,8], index: 1, kind: output, shape index: {}]  }
   0x1   :  { %v348_v0 = vld [vmem:[%s736_s0 + $0xf] ss:$16 sm:%s19_s6]   ;;  %s27_s12 = smov 48  ;;  %s32_s13 = smov 192  ;;  %vm38_vm4 = vcmask 1048512   ;;  %vm60_vm5 = vcmask 982912  }
   0x2   :  { %v349_v1 = vld [vmem:[%s736_s0 + $0xf] ss:$16 sm:%s22_s7]   ;;  %s63_s18 = smov 3  ;;  %s66_s21 = smov 12  ;;  %vm82_vm6 = vcmask 917312   ;;  %vm104_vm7 = vcmask 851712  }
   0x3   :  { %v25_v2 = vsel %vm6_vm0, %v349_v1, %v348_v0  ;;  %v350_v3 = vld [vmem:[%s736_s0 + $0xf] ss:$16 sm:%s27_s12]   ;;  %v356_v6 = vld [vmem:[%s736_s0 + $0xd] ss:$16 sm:%s63_s18]   ;;  %s71_s22 = smov 48  ;;  %s76_s27 = smov 192 }
   0x4   :  { %v351_v4 = vld [vmem:[%s736_s0 + $0xf] ss:$16 sm:%s32_s13]   ;;  %v30_v5 = vsel %vm10_vm1, %v350_v3, %v25_v2  ;;  %v357_v8 = vld [vmem:[%s736_s0 + $0xd] ss:$16 sm:%s66_s21]   ;;  %s423_s28 = smov 120   ;;  %s41_s2 = smov 3 }
   0x5   :  { %v35_v7 = vsel %vm14_vm2, %v351_v4, %v30_v5  ;;  %v358_v9 = vld [vmem:[%s736_s0 + $0xd] ss:$16 sm:%s71_s22]   ;;  %v69_v10 = vsel %vm6_vm0, %v357_v8, %v356_v6  ;;  %s44_s3 = smov 12  ;;  %v352_v13 = vld [vmem:[%s736_s0 + $0xe] ss:$16 sm:%s41_s2]   ;;  %s49_s8 = smov 48 }
   0x6   :  { %36 = vrot.lane.b32.xlu0 %v35_v7, %s423_s28  ;;  %v359_v11 = vld [vmem:[%s736_s0 + $0xd] ss:$16 sm:%s76_s27]   ;;  %v74_v12 = vsel %vm10_vm1, %v358_v9, %v69_v10  ;;  %s54_s9 = smov 192  ;;  %s85_s14 = smov 3  ;;  %vm126_vm8 = vcmask 786112   ;;  %vm148_vm9 = vcmask 720512  }
   0x7   :  { %v353_v14 = vld [vmem:[%s736_s0 + $0xe] ss:$16 sm:%s44_s3]   ;;  %v79_v15 = vsel %vm14_vm2, %v359_v11, %v74_v12  ;;  %s424_s15 = smov 104   ;;  %v360_v20 = vld [vmem:[%s736_s0 + $0xc] ss:$16 sm:%s85_s14]   ;;  %s88_s18 = smov 12 }
   0x8   :  { %v47_v16 = vsel %vm6_vm0, %v353_v14, %v352_v13  ;;  %v354_v17 = vld [vmem:[%s736_s0 + $0xe] ss:$16 sm:%s49_s8]   ;;  %80 = vrot.lane.b32.xlu1 %v79_v15, %s424_s15  ;;  %s93_s19 = smov 48  ;;  %s98_s24 = smov 192  ;;  %vm170_vm10 = vcmask 654912   ;;  %vm192_vm11 = vcmask 589312  }
   0x9   :  { %v355_v18 = vld [vmem:[%s736_s0 + $0xe] ss:$16 sm:%s54_s9]   ;;  %v52_v19 = vsel %vm10_vm1, %v354_v17, %v47_v16  ;;  %v361_v22 = vld [vmem:[%s736_s0 + $0xc] ss:$16 sm:%s88_s18]   ;;  %s425_s25 = smov 112   ;;  %s107_s28 = smov 3 }
   0xa   :  { %v57_v21 = vsel %vm14_vm2, %v355_v18, %v52_v19  ;;  %v362_v23 = vld [vmem:[%s736_s0 + $0xc] ss:$16 sm:%s93_s19]   ;;  %v91_v24 = vsel %vm6_vm0, %v361_v22, %v360_v20  ;;  %s110_s29 = smov 12  ;;  %v364_v27 = vld [vmem:[%s736_s0 + $0xb] ss:$16 sm:%s107_s28]   ;;  %s115_s5 = smov 48 }
   0xb   :  { %58 = vrot.lane.b32.xlu0 %v57_v21, %s425_s25  ;;  %v363_v25 = vld [vmem:[%s736_s0 + $0xc] ss:$16 sm:%s98_s24]   ;;  %v96_v26 = vsel %vm10_vm1, %v362_v23, %v91_v24  ;;  %s120_s6 = smov 192  ;;  %s129_s11 = smov 3  ;;  %vm214_vm12 = vcmask 523712   ;;  %vm236_vm13 = vcmask 458112  }
   0xc   :  { %v365_v28 = vld [vmem:[%s736_s0 + $0xb] ss:$16 sm:%s110_s29]   ;;  %v101_v29 = vsel %vm14_vm2, %v363_v25, %v96_v26  ;;  %s426_s12 = smov 96   ;;  %v368_v34 = vld [vmem:[%s736_s0 + $0xa] ss:$16 sm:%s129_s11]   ;;  %s132_s15 = smov 12 }
   0xd   :  { %v113_v30 = vsel %vm6_vm0, %v365_v28, %v364_v27  ;;  %v366_v31 = vld [vmem:[%s736_s0 + $0xb] ss:$16 sm:%s115_s5]   ;;  %102 = vrot.lane.b32.xlu1 %v101_v29, %s426_s12  ;;  %s137_s16 = smov 48  ;;  %s142_s21 = smov 192  ;;  %vm258_vm14 = vcmask 392512   ;;  %vm280_vm15 = vcmask 326912  }
   0xe   :  { %v367_v32 = vld [vmem:[%s736_s0 + $0xb] ss:$16 sm:%s120_s6]   ;;  %v118_v33 = vsel %vm10_vm1, %v366_v31, %v113_v30  ;;  %v369_v36 = vld [vmem:[%s736_s0 + $0xa] ss:$16 sm:%s132_s15]   ;;  %s427_s22 = smov 88   ;;  %s151_s25 = smov 3 }
   0xf   :  { %v123_v35 = vsel %vm14_vm2, %v367_v32, %v118_v33  ;;  %v370_v37 = vld [vmem:[%s736_s0 + $0xa] ss:$16 sm:%s137_s16]   ;;  %v135_v38 = vsel %vm6_vm0, %v369_v36, %v368_v34  ;;  %s154_s26 = smov 12  ;;  %v372_v41 = vld [vmem:[%s736_s0 + $0x9] ss:$16 sm:%s151_s25]   ;;  %s159_s2 = smov 48 }
  0x10   :  { %124 = vrot.lane.b32.xlu0 %v123_v35, %s427_s22  ;;  %v371_v39 = vld [vmem:[%s736_s0 + $0xa] ss:$16 sm:%s142_s21]   ;;  %v140_v40 = vsel %vm10_vm1, %v370_v37, %v135_v38  ;;  %s164_s3 = smov 192  ;;  %s173_s8 = smov 3 }
  0x11   :  { %v373_v42 = vld [vmem:[%s736_s0 + $0x9] ss:$16 sm:%s154_s26]   ;;  %v145_v43 = vsel %vm14_vm2, %v371_v39, %v140_v40  ;;  %s428_s9 = smov 80   ;;  %v376_v48 = vld [vmem:[%s736_s0 + $0x8] ss:$16 sm:%s173_s8]   ;;  %s176_s12 = smov 12 }
  0x12   :  { %v157_v44 = vsel %vm6_vm0, %v373_v42, %v372_v41  ;;  %v374_v45 = vld [vmem:[%s736_s0 + $0x9] ss:$16 sm:%s159_s2]   ;;  %146 = vrot.lane.b32.xlu1 %v145_v43, %s428_s9  ;;  %s181_s13 = smov 48  ;;  %s186_s18 = smov 192 }
  0x13   :  { %v375_v46 = vld [vmem:[%s736_s0 + $0x9] ss:$16 sm:%s164_s3]   ;;  %v162_v47 = vsel %vm10_vm1, %v374_v45, %v157_v44  ;;  %v377_v50 = vld [vmem:[%s736_s0 + $0x8] ss:$16 sm:%s176_s12]   ;;  %s429_s19 = smov 72   ;;  %s195_s22 = smov 3 }
  0x14   :  { %v167_v49 = vsel %vm14_vm2, %v375_v46, %v162_v47  ;;  %v378_v51 = vld [vmem:[%s736_s0 + $0x8] ss:$16 sm:%s181_s13]   ;;  %v179_v52 = vsel %vm6_vm0, %v377_v50, %v376_v48  ;;  %s198_s23 = smov 12  ;;  %v380_v55 = vld [vmem:[%s736_s0 + $0x7] ss:$16 sm:%s195_s22]   ;;  %s203_s28 = smov 48 }
  0x15   :  { %168 = vrot.lane.b32.xlu0 %v167_v49, %s429_s19  ;;  %v379_v53 = vld [vmem:[%s736_s0 + $0x8] ss:$16 sm:%s186_s18]   ;;  %v184_v54 = vsel %vm10_vm1, %v378_v51, %v179_v52  ;;  %s208_s29 = smov 192  ;;  %s217_s5 = smov 3 }
  0x16   :  { %v381_v56 = vld [vmem:[%s736_s0 + $0x7] ss:$16 sm:%s198_s23]   ;;  %v189_v57 = vsel %vm14_vm2, %v379_v53, %v184_v54  ;;  %s430_s6 = smov 64   ;;  %v384_v62 = vld [vmem:[%s736_s0 + $0x6] ss:$16 sm:%s217_s5]   ;;  %s220_s9 = smov 12 }
  0x17   :  { %v201_v58 = vsel %vm6_vm0, %v381_v56, %v380_v55  ;;  %v382_v59 = vld [vmem:[%s736_s0 + $0x7] ss:$16 sm:%s203_s28]   ;;  %190 = vrot.lane.b32.xlu1 %v189_v57, %s430_s6  ;;  %s225_s10 = smov 48  ;;  %s230_s15 = smov 192 }
  0x18   :  { %v383_v60 = vld [vmem:[%s736_s0 + $0x7] ss:$16 sm:%s208_s29]   ;;  %v206_v61 = vsel %vm10_vm1, %v382_v59, %v201_v58  ;;  %v385_v0 = vld [vmem:[%s736_s0 + $0x6] ss:$16 sm:%s220_s9]   ;;  %s431_s16 = smov 56   ;;  %s239_s19 = smov 3 }
  0x19   :  { %v211_v63 = vsel %vm14_vm2, %v383_v60, %v206_v61  ;;  %v386_v1 = vld [vmem:[%s736_s0 + $0x6] ss:$16 sm:%s225_s10]   ;;  %v223_v2 = vsel %vm6_vm0, %v385_v0, %v384_v62  ;;  %s242_s20 = smov 12  ;;  %v388_v5 = vld [vmem:[%s736_s0 + $0x5] ss:$16 sm:%s239_s19]   ;;  %s247_s25 = smov 48 }
  0x1a   :  { %212 = vrot.lane.b32.xlu0 %v211_v63, %s431_s16  ;;  %v387_v3 = vld [vmem:[%s736_s0 + $0x6] ss:$16 sm:%s230_s15]   ;;  %v228_v4 = vsel %vm10_vm1, %v386_v1, %v223_v2  ;;  %s252_s26 = smov 192  ;;  %s261_s2 = smov 3 }
  0x1b   :  { %v389_v6 = vld [vmem:[%s736_s0 + $0x5] ss:$16 sm:%s242_s20]   ;;  %v233_v7 = vsel %vm14_vm2, %v387_v3, %v228_v4  ;;  %s432_s3 = smov 48   ;;  %v392_v12 = vld [vmem:[%s736_s0 + $0x4] ss:$16 sm:%s261_s2]   ;;  %s264_s6 = smov 12 }
  0x1c   :  { %v245_v8 = vsel %vm6_vm0, %v389_v6, %v388_v5  ;;  %v390_v9 = vld [vmem:[%s736_s0 + $0x5] ss:$16 sm:%s247_s25]   ;;  %234 = vrot.lane.b32.xlu1 %v233_v7, %s432_s3  ;;  %s269_s7 = smov 48  ;;  %s274_s12 = smov 192 }
  0x1d   :  { %v391_v10 = vld [vmem:[%s736_s0 + $0x5] ss:$16 sm:%s252_s26]   ;;  %v250_v11 = vsel %vm10_vm1, %v390_v9, %v245_v8  ;;  %v393_v14 = vld [vmem:[%s736_s0 + $0x4] ss:$16 sm:%s264_s6]   ;;  %s433_s13 = smov 40   ;;  %s283_s16 = smov 3 }
  0x1e   :  { %v255_v13 = vsel %vm14_vm2, %v391_v10, %v250_v11  ;;  %v394_v15 = vld [vmem:[%s736_s0 + $0x4] ss:$16 sm:%s269_s7]   ;;  %v267_v16 = vsel %vm6_vm0, %v393_v14, %v392_v12  ;;  %s286_s17 = smov 12  ;;  %v396_v19 = vld [vmem:[%s736_s0 + $0x3] ss:$16 sm:%s283_s16]   ;;  %s291_s22 = smov 48 }
  0x1f   :  { %256 = vrot.lane.b32.xlu0 %v255_v13, %s433_s13  ;;  %v395_v17 = vld [vmem:[%s736_s0 + $0x4] ss:$16 sm:%s274_s12]   ;;  %v272_v18 = vsel %vm10_vm1, %v394_v15, %v267_v16  ;;  %s296_s23 = smov 192  ;;  %s305_s28 = smov 3 }
  0x20   :  { %v397_v20 = vld [vmem:[%s736_s0 + $0x3] ss:$16 sm:%s286_s17]   ;;  %v277_v21 = vsel %vm14_vm2, %v395_v17, %v272_v18  ;;  %s434_s29 = smov 32   ;;  %v400_v26 = vld [vmem:[%s736_s0 + $0x2] ss:$16 sm:%s305_s28]   ;;  %s308_s3 = smov 12 }
  0x21   :  { %v289_v22 = vsel %vm6_vm0, %v397_v20, %v396_v19  ;;  %v398_v23 = vld [vmem:[%s736_s0 + $0x3] ss:$16 sm:%s291_s22]   ;;  %278 = vrot.lane.b32.xlu1 %v277_v21, %s434_s29  ;;  %s313_s4 = smov 48  ;;  %s318_s9 = smov 192 }
  0x22   :  { %v399_v24 = vld [vmem:[%s736_s0 + $0x3] ss:$16 sm:%s296_s23]   ;;  %v294_v25 = vsel %vm10_vm1, %v398_v23, %v289_v22  ;;  %v401_v28 = vld [vmem:[%s736_s0 + $0x2] ss:$16 sm:%s308_s3]   ;;  %s435_s10 = smov 24   ;;  %s327_s13 = smov 3 }
  0x23   :  { %v299_v27 = vsel %vm14_vm2, %v399_v24, %v294_v25  ;;  %v402_v29 = vld [vmem:[%s736_s0 + $0x2] ss:$16 sm:%s313_s4]   ;;  %v311_v30 = vsel %vm6_vm0, %v401_v28, %v400_v26  ;;  %s330_s14 = smov 12  ;;  %v404_v33 = vld [vmem:[%s736_s0 + $0x1] ss:$16 sm:%s327_s13]   ;;  %s335_s19 = smov 48 }
  0x24   :  { %300 = vrot.lane.b32.xlu0 %v299_v27, %s435_s10  ;;  %v403_v31 = vld [vmem:[%s736_s0 + $0x2] ss:$16 sm:%s318_s9]   ;;  %v316_v32 = vsel %vm10_vm1, %v402_v29, %v311_v30  ;;  %s340_s20 = smov 192  ;;  %s2_s25 = smov 3 }
  0x25   :  { %v405_v34 = vld [vmem:[%s736_s0 + $0x1] ss:$16 sm:%s330_s14]   ;;  %v321_v35 = vsel %vm14_vm2, %v403_v31, %v316_v32  ;;  %s436_s26 = smov 16   ;;  %s4_s27 = smov 12  ;;  %v3_v40 = vld [vmem:[%s736_s0] ss:$16 sm:%s2_s25]  }
  0x26   :  { %v333_v36 = vsel %vm6_vm0, %v405_v34, %v404_v33  ;;  %v406_v37 = vld [vmem:[%s736_s0 + $0x1] ss:$16 sm:%s335_s19]   ;;  %322 = vrot.lane.b32.xlu1 %v321_v35, %s436_s26  ;;  %s8_s28 = smov 48  ;;  %s12_s2 = smov 192 }
  0x27   :  { %v407_v38 = vld [vmem:[%s736_s0 + $0x1] ss:$16 sm:%s340_s20]   ;;  %v338_v39 = vsel %vm10_vm1, %v406_v37, %v333_v36  ;;  %v5_v42 = vld [vmem:[%s736_s0] ss:$16 sm:%s4_s27]   ;;  %s437_s7 = smov 8  }
  0x28   :  { %v343_v41 = vsel %vm14_vm2, %v407_v38, %v338_v39  ;;  %v9_v43 = vld [vmem:[%s736_s0] ss:$16 sm:%s8_s28]   ;;  %v7_v44 = vsel %vm6_vm0, %v5_v42, %v3_v40  ;;  %vm302_vm0 = vcmask 261312  }
  0x29   :  { %344 = vrot.lane.b32.xlu0 %v343_v41, %s437_s7  ;;  %v13_v45 = vld [vmem:[%s736_s0] ss:$16 sm:%s12_s2]   ;;  %v11_v46 = vsel %vm10_vm1, %v9_v43, %v7_v44  ;;  %vm324_vm1 = vcmask 195712  }
  0x2a   :  { %v15_v47 = vsel %vm14_vm2, %v13_v45, %v11_v46  ;;  %vm346_vm2 = vcmask 130112  }
  0x2b   :  { %17 = vst.msk [vmem:[%s737_s1] sm:$0xff] %vm16_vm3, %v15_v47  }
  0x78   :  { %v37_v48 = vpop.permute.xlu0 %36  }
  0x79   :  { %39 = vst.msk [vmem:[%s737_s1] sm:$0xff] %vm38_vm4, %v37_v48  }
  0x7a   :  { %v81_v49 = vpop.permute.xlu1 %80  }
  0x7d   :  { %v59_v50 = vpop.permute.xlu0 %58  }
  0x7e   :  { %61 = vst.msk [vmem:[%s737_s1] sm:$0xff] %vm60_vm5, %v59_v50  }
  0x7f   :  { %83 = vst.msk [vmem:[%s737_s1] sm:$0xff] %vm82_vm6, %v81_v49   ;;  %v103_v51 = vpop.permute.xlu1 %102  }
  0x80   :  { %105 = vst.msk [vmem:[%s737_s1] sm:$0xff] %vm104_vm7, %v103_v51  }
  0x82   :  { %v125_v52 = vpop.permute.xlu0 %124  }
  0x83   :  { %127 = vst.msk [vmem:[%s737_s1] sm:$0xff] %vm126_vm8, %v125_v52  }
  0x84   :  { %v147_v53 = vpop.permute.xlu1 %146  }
  0x85   :  { %149 = vst.msk [vmem:[%s737_s1] sm:$0xff] %vm148_vm9, %v147_v53  }
  0x87   :  { %v169_v54 = vpop.permute.xlu0 %168  }
  0x88   :  { %171 = vst.msk [vmem:[%s737_s1] sm:$0xff] %vm170_vm10, %v169_v54  }
  0x89   :  { %v191_v55 = vpop.permute.xlu1 %190  }
  0x8a   :  { %193 = vst.msk [vmem:[%s737_s1] sm:$0xff] %vm192_vm11, %v191_v55  }
  0x8c   :  { %v213_v56 = vpop.permute.xlu0 %212  }
  0x8d   :  { %215 = vst.msk [vmem:[%s737_s1] sm:$0xff] %vm214_vm12, %v213_v56  }
  0x8e   :  { %v235_v57 = vpop.permute.xlu1 %234  }
  0x8f   :  { %237 = vst.msk [vmem:[%s737_s1] sm:$0xff] %vm236_vm13, %v235_v57  }
  0x91   :  { %v257_v58 = vpop.permute.xlu0 %256  }
  0x92   :  { %259 = vst.msk [vmem:[%s737_s1] sm:$0xff] %vm258_vm14, %v257_v58  }
  0x93   :  { %v279_v59 = vpop.permute.xlu1 %278  }
  0x94   :  { %281 = vst.msk [vmem:[%s737_s1] sm:$0xff] %vm280_vm15, %v279_v59  }
  0x96   :  { %v301_v60 = vpop.permute.xlu0 %300  }
  0x97   :  { %303 = vst.msk [vmem:[%s737_s1] sm:$0xff] %vm302_vm0, %v301_v60  }
  0x98   :  { %v323_v61 = vpop.permute.xlu1 %322  }
  0x99   :  { %325 = vst.msk [vmem:[%s737_s1] sm:$0xff] %vm324_vm1, %v323_v61  }
  0x9b   :  { %v345_v62 = vpop.permute.xlu0 %344  }
  0x9c   :  { %347 = vst.msk [vmem:[%s737_s1] sm:$0xff] %vm346_vm2, %v345_v62  }

// kernel: cnn_2d_for_comparable_features_pallas.1
= control target key start
LH: loop header
LB: loop body
LE: loop exit
PB: predicated region body
PF: predicated region fallthrough
CT: control target
= control target key end

     0   :  { %s2868_s21 = smov 0   ;;  %s3461_s0 = inlined_call_operand.vmem [shape: f32[32,128], index: 0, kind: input, shape index: {}]   ;;  %s3462_s1 = inlined_call_operand.vmem [shape: f32[128,8], index: 1, kind: input, shape index: {}]   ;;  %s3463_s2 = inlined_call_operand.vmem [shape: f32[8,128], index: 2, kind: input, shape index: {}]   ;;  %s3464_s3 = inlined_call_operand.vmem [shape: f32[2,32,32], index: 3, kind: input, shape index: {}]   ;;  %s3465_s4 = inlined_call_operand.vmem [shape: f32[2,4,8], index: 4, kind: input, shape index: {}]   ;;  %s3466_s5 = inlined_call_operand.vmem [shape: f32[2,6,128,128], index: 5, kind: input, shape index: {}]   ;;  %s3467_s6 = inlined_call_operand.vmem [shape: f32[32,128], index: 6, kind: output, shape index: {}]  }
   0x1 LB: > { %s2019_s22 = sadd.s32 4294967295, %s2829_s21   ;;  %p2022_p0 = scmp.ge.s32.totalorder %s2829_s21, 1  ;;  %s2829_s21 = sphi %s2868_s21, %s16_s21  }
   0x2   : > { %p216_p1 = scmp.lt.s32.totalorder %s2829_s21, 3 }
   0x4   : > { %p217_p2 = pnand %p2022_p0, %p216_p1 }
   0x5   : > { %p245_p3 = scmp.lt.s32.totalorder (!%p217_p2), %s2019_s22, 1  ;;  %p2025_p4 = scmp.ne.s32.totalorder (!%p217_p2), %s2019_s22, 0 }
   0x6   : > { %220 = sbr.rel (%p217_p2) target bundleno = 1755 (0x6db), region = 44 }
   0xb   : > { %s246_s23 = scalar_select %p245_p3, %s2019_s22, 1 }
   0xc   : > { %257 = sbr.rel (%p2025_p4) target bundleno = 20 (0x14), region = 48 }
   0xd   : > { %s2023_s24 = sshll.u32 %s246_s23, 2  ;;  %s2804_s25 = smul.u32 768, %s246_s23 }
   0xe   : > { %s2879_s28 = scalar_lea.vmem %s3465_s4, %s2023_s24 }
   0xf   : > { %s2884_s7 = scalar_lea.vmem %s3466_s5, %s2804_s25 }
  0x11   : > { %v258_v0 = vld [vmem:[%s3461_s0] sm:$0xff]  ;;  %v259_v1 = vld [vmem:[%s3461_s0 + $0x8] sm:$0xff]  ;;  %v260_v2 = vld [vmem:[%s3461_s0 + $0x10] sm:$0xff] }
  0x12   : > { %262 = vst [vmem:[%s3467_s6] sm:$0xff] %v258_v0  ;;  %263 = vst [vmem:[%s3467_s6 + $0x8] sm:$0xff] %v259_v1  ;;  %v261_v3 = vld [vmem:[%s3461_s0 + $0x18] sm:$0xff] }
  0x13   : > { %264 = vst [vmem:[%s3467_s6 + $0x10] sm:$0xff] %v260_v2  ;;  %265 = vst [vmem:[%s3467_s6 + $0x18] sm:$0xff] %v261_v3 }
  0x14 PF: > { %v2913_v4 = vld [vmem:[%s3462_s1 + $0x78] sm:$0xff]  ;;  %v2831_v5 = vmov 0.0   ;;  %v2920_v6 = vld [vmem:[%s3462_s1 + $0x70] sm:$0xff]  ;;  %v2929_v7 = vld [vmem:[%s3462_s1 + $0x68] sm:$0xff]  ;;  %vm2832_vm0 = vmmov 0   ;;  %vm472_vm1 = vcmask 64512  }
  0x15   : > { %2360 = vmatprep.subr.mxu0 %v2831_v5  ;;  %2395 = vmatprep.subr.mxu1 %v2831_v5  ;;  %v2938_v8 = vld [vmem:[%s3462_s1 + $0x60] sm:$0xff]  ;;  %v2973_v16 = vld [vmem:[%s3462_s1 + $0x58] sm:$0xff]  ;;  %v2987_v21 = vld [vmem:[%s3462_s1 + $0x50] sm:$0xff]  ;;  %vm640_vm2 = vcmask 261120  }
  0x16   : > { %2361 = vmatpush3.msra.mxu0 %v2913_v4  ;;  %2396 = vmatpush3.msra.mxu1 %v2913_v4  ;;  %v2997_v24 = vld [vmem:[%s3462_s1 + $0x48] sm:$0xff]  ;;  %v3006_v27 = vld [vmem:[%s3462_s1 + $0x40] sm:$0xff]  ;;  %v3015_v30 = vld [vmem:[%s3462_s1 + $0x38] sm:$0xff] }
  0x17   : > { %2362 = vmatprep.subr.mxu0 %v2831_v5  ;;  %2397 = vmatprep.subr.mxu1 %v2831_v5  ;;  %v3024_v32 = vld [vmem:[%s3462_s1 + $0x30] sm:$0xff]  ;;  %v3033_v35 = vld [vmem:[%s3462_s1 + $0x28] sm:$0xff]  ;;  %v3042_v36 = vld [vmem:[%s3462_s1 + $0x20] sm:$0xff] }
  0x18   : > { %2363 = vmatpush3.msra.mxu0 %v2920_v6  ;;  %2398 = vmatpush3.msra.mxu1 %v2920_v6  ;;  %v3051_v39 = vld [vmem:[%s3462_s1 + $0x18] sm:$0xff]  ;;  %v3060_v40 = vld [vmem:[%s3462_s1 + $0x10] sm:$0xff]  ;;  %v3069_v43 = vld [vmem:[%s3462_s1 + $0x8] sm:$0xff] }
  0x19   : > { %2364 = vmatprep.subr.mxu0 %v2831_v5  ;;  %2399 = vmatprep.subr.mxu1 %v2831_v5  ;;  %v2943_v9 = vld [vmem:[%s3467_s6] sm:$0xff]  ;;  %v2948_v10 = vld [vmem:[%s3467_s6 + $0x8] sm:$0xff]  ;;  %v850_v2 = vld [vmem:[%s2884_s7 + $0x78] sm:$0xff] }
  0x1a   : > { %2365 = vmatpush3.msra.mxu0 %v2929_v7  ;;  %2400 = vmatpush3.msra.mxu1 %v2929_v7  ;;  %v2955_v11 = vld [vmem:[%s3467_s6 + $0x10] sm:$0xff]  ;;  %v2960_v12 = vld [vmem:[%s3467_s6 + $0x18] sm:$0xff]  ;;  %v297_v13 = vadd.f32 %v2948_v10, %v2943_v9  ;;  %v306_v14 = vmul.f32 %v2943_v9, %v2943_v9  ;;  %v307_v15 = vmul.f32 %v2948_v10, %v2948_v10  ;;  %v3078_v44 = vld [vmem:[%s3462_s1] sm:$0xff] }
  0x1b   : > { %2366 = vmatprep.subr.mxu0 %v2831_v5  ;;  %2401 = vmatprep.subr.mxu1 %v2831_v5  ;;  %v308_v17 = vmul.f32 %v2955_v11, %v2955_v11  ;;  %v309_v19 = vmul.f32 %v2960_v12, %v2960_v12  ;;  %v3096_v47 = vld [vmem:[%s3463_s2] sm:$0xff]  ;;  %v849_v3 = vld [vmem:[%s2884_s7 + $0x70] sm:$0xff] }
  0x1c   : > { %2367 = vmatpush3.msra.mxu0 %v2938_v8  ;;  %2402 = vmatpush3.msra.mxu1 %v2938_v8  ;;  %v298_v18 = vadd.f32 %v297_v13, %v2955_v11  ;;  %v310_v20 = vadd.f32 %v307_v15, %v306_v14  ;;  %v3101_v58 = vld [vmem:[%s2879_s28] sm:$0xf]  ;;  %v848_v13 = vld [vmem:[%s2884_s7 + $0x68] sm:$0xff]  ;;  %v846_v15 = vld [vmem:[%s2884_s7 + $0x58] sm:$0xff] }
  0x1d   : > { %2368 = vmatprep.subr.mxu0 %v2831_v5  ;;  %2403 = vmatprep.subr.mxu1 %v2831_v5  ;;  %v3113_v1 = vld [vmem:[%s3464_s3] sm:$0xff] }
  0x1e   : > { %2369 = vmatpush3.msra.mxu0 %v2973_v16  ;;  %2404 = vmatpush3.msra.mxu1 %v2973_v16  ;;  %v299_v22 = vadd.f32 %v298_v18, %v2960_v12  ;;  %v311_v23 = vadd.f32 %v310_v20, %v308_v17  ;;  %v847_v14 = vld [vmem:[%s2884_s7 + $0x60] sm:$0xff]  ;;  %v845_v17 = vld [vmem:[%s2884_s7 + $0x50] sm:$0xff]  ;;  %v844_v18 = vld [vmem:[%s2884_s7 + $0x48] sm:$0xff] }
  0x1f   : > { %2370 = vmatprep.subr.mxu0 %v2831_v5  ;;  %2405 = vmatprep.subr.mxu1 %v2831_v5  ;;  %v842_v20 = vld [vmem:[%s2884_s7 + $0x38] sm:$0xff] }
  0x20   : > { %2371 = vmatpush3.msra.mxu0 %v2987_v21  ;;  %2406 = vmatpush3.msra.mxu1 %v2987_v21  ;;  %v300_v25 = vrot.slane %v299_v22, 4  ;;  %v312_v26 = vadd.f32 %v311_v23, %v309_v19  ;;  %v843_v19 = vld [vmem:[%s2884_s7 + $0x40] sm:$0xff]  ;;  %v840_v23 = vld [vmem:[%s2884_s7 + $0x28] sm:$0xff] }
  0x21   : > { %2372 = vmatprep.subr.mxu0 %v2831_v5  ;;  %2407 = vmatprep.subr.mxu1 %v2831_v5 }
  0x22   : > { %2373 = vmatpush3.msra.mxu0 %v2997_v24  ;;  %2408 = vmatpush3.msra.mxu1 %v2997_v24  ;;  %v301_v28 = vadd.f32 %v300_v25, %v299_v22  ;;  %v313_v29 = vrot.slane %v312_v26, 4  ;;  %v841_v22 = vld [vmem:[%s2884_s7 + $0x30] sm:$0xff]  ;;  %v839_v25 = vld [vmem:[%s2884_s7 + $0x20] sm:$0xff] }
  0x23   : > { %2374 = vmatprep.subr.mxu0 %v2831_v5  ;;  %2409 = vmatprep.subr.mxu1 %v2831_v5 }
  0x24   : > { %2375 = vmatpush3.msra.mxu0 %v3006_v27  ;;  %2410 = vmatpush3.msra.mxu1 %v3006_v27  ;;  %v314_v31 = vadd.f32 %v313_v29, %v312_v26  ;;  %v302_v33 = vrot.slane %v301_v28, 2  ;;  %v838_v26 = vld [vmem:[%s2884_s7 + $0x18] sm:$0xff]  ;;  %v620_v29 = vlaneseq }
  0x25   : > { %2376 = vmatprep.subr.mxu0 %v2831_v5  ;;  %2411 = vmatprep.subr.mxu1 %v2831_v5 }
  0x26   : > { %2377 = vmatpush3.msra.mxu0 %v3015_v30  ;;  %2412 = vmatpush3.msra.mxu1 %v3015_v30  ;;  %v315_v34 = vrot.slane %v314_v31, 2  ;;  %v303_v37 = vadd.f32 %v302_v33, %v301_v28  ;;  %v837_v28 = vld [vmem:[%s2884_s7 + $0x10] sm:$0xff] }
  0x27   : > { %2378 = vmatprep.subr.mxu0 %v2831_v5  ;;  %2413 = vmatprep.subr.mxu1 %v2831_v5 }
  0x28   : > { %2379 = vmatpush3.msra.mxu0 %v3024_v32  ;;  %2414 = vmatpush3.msra.mxu1 %v3024_v32  ;;  %v316_v38 = vadd.f32 %v315_v34, %v314_v31  ;;  %v304_v41 = vrot.slane %v303_v37, 1  ;;  %v621_v31 = vshrl.u32 %v620_v29, 7  ;;  %v2071_v29 = vld [vmem:[%s2884_s7 + $0x178] sm:$0xff] }
  0x29   : > { %2380 = vmatprep.subr.mxu0 %v2831_v5  ;;  %2415 = vmatprep.subr.mxu1 %v2831_v5 }
  0x2a   : > { %2381 = vmatpush3.msra.mxu0 %v3033_v35  ;;  %2416 = vmatpush3.msra.mxu1 %v3033_v35  ;;  %v317_v42 = vrot.slane %v316_v38, 1  ;;  %v305_v45 = vadd.f32 %v304_v41, %v303_v37  ;;  %v3131_v34 = vsub.s32 0, %v621_v31  ;;  %v2070_v31 = vld [vmem:[%s2884_s7 + $0x170] sm:$0xff] }
  0x2b   : > { %2382 = vmatprep.subr.mxu0 %v2831_v5  ;;  %2417 = vmatprep.subr.mxu1 %v2831_v5 }
  0x2c   : > { %2383 = vmatpush3.msra.mxu0 %v3042_v36  ;;  %2418 = vmatpush3.msra.mxu1 %v3042_v36  ;;  %v318_v46 = vadd.f32 %v317_v42, %v316_v38 }
  0x2d   : > { %2384 = vmatprep.subr.mxu0 %v2831_v5  ;;  %2419 = vmatprep.subr.mxu1 %v2831_v5 }
  0x2e   : > { %2385 = vmatpush3.msra.mxu0 %v3051_v39  ;;  %2420 = vmatpush3.msra.mxu1 %v3051_v39 }
  0x2f   : > { %2386 = vmatprep.subr.mxu0 %v2831_v5  ;;  %2421 = vmatprep.subr.mxu1 %v2831_v5 }
  0x30   : > { %2387 = vmatpush3.msra.mxu0 %v3060_v40  ;;  %2422 = vmatpush3.msra.mxu1 %v3060_v40 }
  0x31   : > { %2388 = vmatprep.subr.mxu0 %v2831_v5  ;;  %2423 = vmatprep.subr.mxu1 %v2831_v5 }
  0x32   : > { %2389 = vmatpush3.msra.mxu0 %v3069_v43  ;;  %2424 = vmatpush3.msra.mxu1 %v3069_v43 }
  0x33   : > { %2390 = vmatprep.subr.mxu0 %v2831_v5  ;;  %2425 = vmatprep.subr.mxu1 %v2831_v5 }
  0x34   : > { %2391 = vmatpush3.msra.mxu0 %v3078_v44  ;;  %2392 = vmatprep.mubr.msk.f32.mxu0 %vm2832_vm0, %v2831_v5 }
  0x35   : > { %2426 = vmatpush3.msra.mxu1 %v3078_v44  ;;  %2427 = vmatprep.mubr.msk.f32.mxu1 %vm2832_vm0, %v2831_v5 }
  0x36   : > { %2393 = vmatmul.mubr.f32.vlgmr.msra.gmra.mxu0 %v305_v45  ;;  %2428 = vmatmul.mubr.f32.vlgmr.msra.gmra.mxu1 %v318_v46 }
  0x37   : > { %2430 = vmatprep.subr.mxu0 %v2831_v5  ;;  %2432 = vmatprep.mubr.msk.f32.mxu0 %vm2832_vm0, %v2831_v5 }
  0x38   : > { %2431 = vmatpush3.msra.mxu0 %v3096_v47  ;;  %2506 = vmatprep.subr.mxu1 %v850_v2 }
  0x39   : > { %2435 = vmatprep.subr.mxu0 %v2831_v5  ;;  %2507 = vmatpush3.msra.mxu1 %v850_v2  ;;  %v2053_v2 = vld [vmem:[%s2884_s7 + $0xe8] sm:$0xff] }
  0x3a   : > { %2508 = vmatprep.subr.mxu1 %v849_v3 }
  0x3b   : > { %2509 = vmatpush3.msra.mxu1 %v849_v3  ;;  %v2052_v3 = vld [vmem:[%s2884_s7 + $0xe0] sm:$0xff] }
  0x3c   : > { %2510 = vmatprep.subr.mxu1 %v848_v13 }
  0x3d   : > { %2511 = vmatpush3.msra.mxu1 %v848_v13  ;;  %v2051_v13 = vld [vmem:[%s2884_s7 + $0xd8] sm:$0xff] }
  0x3e   : > { %2512 = vmatprep.subr.mxu1 %v847_v14 }
  0x3f   : > { %2513 = vmatpush3.msra.mxu1 %v847_v14  ;;  %v2050_v14 = vld [vmem:[%s2884_s7 + $0xd0] sm:$0xff] }
  0x40   : > { %2514 = vmatprep.subr.mxu1 %v846_v15 }
  0x41   : > { %2515 = vmatpush3.msra.mxu1 %v846_v15  ;;  %v2049_v15 = vld [vmem:[%s2884_s7 + $0xc8] sm:$0xff] }
  0x42   : > { %2516 = vmatprep.subr.mxu1 %v845_v17 }
  0x43   : > { %2517 = vmatpush3.msra.mxu1 %v845_v17  ;;  %v2048_v17 = vld [vmem:[%s2884_s7 + $0xc0] sm:$0xff] }
  0x44   : > { %2518 = vmatprep.subr.mxu1 %v844_v18 }
  0x45   : > { %2519 = vmatpush3.msra.mxu1 %v844_v18  ;;  %v2047_v18 = vld [vmem:[%s2884_s7 + $0xb8] sm:$0xff] }
  0x46   : > { %2520 = vmatprep.subr.mxu1 %v843_v19 }
  0x47   : > { %2521 = vmatpush3.msra.mxu1 %v843_v19  ;;  %v2046_v19 = vld [vmem:[%s2884_s7 + $0xb0] sm:$0xff] }
  0x48   : > { %2522 = vmatprep.subr.mxu1 %v842_v20 }
  0x49   : > { %2523 = vmatpush3.msra.mxu1 %v842_v20  ;;  %v2045_v20 = vld [vmem:[%s2884_s7 + $0xa8] sm:$0xff] }
  0x4a   : > { %2524 = vmatprep.subr.mxu1 %v841_v22 }
  0x4b   : > { %2525 = vmatpush3.msra.mxu1 %v841_v22  ;;  %v2044_v22 = vld [vmem:[%s2884_s7 + $0xa0] sm:$0xff] }
  0x4c   : > { %2526 = vmatprep.subr.mxu1 %v840_v23 }
  0x4d   : > { %2527 = vmatpush3.msra.mxu1 %v840_v23  ;;  %v2043_v23 = vld [vmem:[%s2884_s7 + $0x98] sm:$0xff] }
  0x4e   : > { %2528 = vmatprep.subr.mxu1 %v839_v25 }
  0x4f   : > { %2529 = vmatpush3.msra.mxu1 %v839_v25  ;;  %v2042_v25 = vld [vmem:[%s2884_s7 + $0x90] sm:$0xff] }
  0x50   : > { %2530 = vmatprep.subr.mxu1 %v838_v26 }
  0x51   : > { %2531 = vmatpush3.msra.mxu1 %v838_v26  ;;  %v2041_v26 = vld [vmem:[%s2884_s7 + $0x88] sm:$0xff] }
  0x52   : > { %2532 = vmatprep.subr.mxu1 %v837_v28 }
  0x53   : > { %2533 = vmatpush3.msra.mxu1 %v837_v28  ;;  %v2040_v28 = vld [vmem:[%s2884_s7 + $0x80] sm:$0xff] }
  0xf6   : > { %v385_v48 = vpop.f32.mrf.mxu0  ;;  %v455_v49 = vpop.f32.mrf.mxu1 }
  0xf7   : > { %v459_v50 = vmul.f32 0.001953125, %v385_v48  ;;  %v460_v51 = vmul.f32 0.001953125, %v455_v49 }
  0xf8   : > { %v2394_v52 = vpop.f32.mrf.mxu0  ;;  %v2429_v53 = vpop.f32.mrf.mxu1 }
  0xf9   : > { %v461_v54 = vmul.f32 %v459_v50, %v459_v50 }
  0xfb   : > { %v462_v55 = vsub.f32 %v460_v51, %v461_v54 }
  0xfd   : > { %v463_v56 = vmax.f32 %v462_v55, 0.0 }
  0xff   : > { %v464_v57 = vadd.f32 1e-05, %v463_v56 }
 0x101   : > { %2815 = vrsqrt.f32 %v464_v57  ;;  %v3170_v57 = vld [vmem:[%s3464_s3 + $0x18] sm:$0xff] }
 0x10e   : > { %v2816_v59 = vpop.eup %2815 }
 0x10f   : > { %v466_v60 = vmul.f32 %v2816_v59, %v3101_v58  ;;  %v3176_v59 = vld [vmem:[%s3464_s3 + $0x20] sm:$0xff] }
 0x111   : > { %v467_v61 = vmul.f32 %v466_v60, %v459_v50  ;;  %2433 = vmatmul.mubr.msk.f32.vlgmr.msra.gmra.mxu0 %vm472_vm1, %v466_v60  ;;  %v3188_v60 = vld [vmem:[%s3464_s3 + $0x28] sm:$0xff] }
 0x112   : > { %2436 = vmatpush3.msra.mxu0 %v3096_v47  ;;  %2437 = vmatprep.mubr.msk.f32.mxu0 %vm2832_vm0, %v2831_v5 }
 0x113   : > { %v469_v62 = vrot.slane %v467_v61, 7  ;;  %v2055_v61 = vld [vmem:[%s2884_s7 + $0xf8] sm:$0xff] }
 0x115   : > { %v471_v63 = vsub.f32 %v3101_v58, %v469_v62  ;;  %v3194_v62 = vld [vmem:[%s3464_s3 + $0x30] sm:$0xff] }
 0x117   : > { %v547_v0 = vrot.slane %v471_v63, 1  ;;  %v2054_v63 = vld [vmem:[%s2884_s7 + $0xf0] sm:$0xff] }
 0x119   : > { %2438 = vmatmul.mubr.msk.f32.vlgmr.msra.gmra.mxu0 %vm472_vm1, %v547_v0  ;;  %v3204_v0 = vld [vmem:[%s3464_s3 + $0x38] sm:$0xff] }
 0x11a   : > { %2448 = vmatprep.mubr.msk.f32.mxu0 %vm640_vm2, %v3113_v1 }
 0x1d1   : > { %v542_v33 = vpop.f32.mrf.mxu0 }
 0x1d2   : > { %v623_v38 = vrot.slane %v542_v33, %v3131_v34  ;;  %v2069_v33 = vld [vmem:[%s2884_s7 + $0x168] sm:$0xff] }
 0x1d3   : > { %v2434_v37 = vpop.f32.mrf.mxu0 }
 0x1d4   : > { %v626_v42 = vmul.f32 %v623_v38, %v2955_v11  ;;  %v627_v45 = vmul.f32 %v623_v38, %v2960_v12  ;;  %v625_v49 = vmul.f32 %v623_v38, %v2948_v10  ;;  %v624_v52 = vmul.f32 %v623_v38, %v2943_v9  ;;  %v3154_v9 = vld [vmem:[%s3464_s3 + $0x8] sm:$0xff]  ;;  %v3159_v12 = vld [vmem:[%s3464_s3 + $0x10] sm:$0xff]  ;;  %v2068_v37 = vld [vmem:[%s2884_s7 + $0x160] sm:$0xff] }
 0x1d5   : > { %v2067_v38 = vld [vmem:[%s2884_s7 + $0x158] sm:$0xff] }
 0x1d9   : > { %v616_v41 = vpop.f32.mrf.mxu0 }
 0x1da   : > { %v631_v46 = vrot.slane %v616_v41, %v3131_v34  ;;  %v2066_v41 = vld [vmem:[%s2884_s7 + $0x150] sm:$0xff] }
 0x1db   : > { %v2439_v48 = vpop.f32.mrf.mxu0 }
 0x1dc   : > { %v634_v50 = vadd.f32 %v631_v46, %v626_v42  ;;  %v635_v51 = vadd.f32 %v631_v46, %v627_v45  ;;  %v633_v53 = vadd.f32 %v631_v46, %v625_v49  ;;  %v632_v55 = vadd.f32 %v631_v46, %v624_v52  ;;  %v2065_v42 = vld [vmem:[%s2884_s7 + $0x148] sm:$0xff]  ;;  %v2064_v45 = vld [vmem:[%s2884_s7 + $0x140] sm:$0xff]  ;;  %v2063_v46 = vld [vmem:[%s2884_s7 + $0x138] sm:$0xff] }
 0x1dd   : > { %v2062_v48 = vld [vmem:[%s2884_s7 + $0x130] sm:$0xff]  ;;  %v836_v49 = vld [vmem:[%s2884_s7 + $0x8] sm:$0xff]  ;;  %v2060_v52 = vld [vmem:[%s2884_s7 + $0x120] sm:$0xff] }
 0x1de   : > { %v3139_v54 = vmax.f32 %v635_v51, 0.0  ;;  %v3141_v56 = vmax.f32 %v634_v50, 0.0  ;;  %v3145_v11 = vmax.f32 %v633_v53, 0.0  ;;  %v636_v10 = vmax.f32 %v632_v55, 0.0  ;;  %v2061_v50 = vld [vmem:[%s2884_s7 + $0x128] sm:$0xff]  ;;  %2534 = vmatprep.subr.mxu1 %v836_v49  ;;  %v835_v51 = vld [vmem:[%s2884_s7] sm:$0xff] }
 0x1df   : > { %2535 = vmatpush3.msra.mxu1 %v836_v49  ;;  %v2059_v53 = vld [vmem:[%s2884_s7 + $0x118] sm:$0xff]  ;;  %v2057_v55 = vld [vmem:[%s2884_s7 + $0x108] sm:$0xff] }
 0x1e0   : > { %2440 = vmatprep.subr.mxu0 %v3139_v54  ;;  %2536 = vmatprep.subr.mxu1 %v835_v51 }
 0x1e1   : > { %2441 = vmatpush3.msra.mxu0 %v3139_v54  ;;  %2537 = vmatpush3.msra.mxu1 %v835_v51 }
 0x1e2   : > { %2442 = vmatprep.subr.mxu0 %v3141_v56  ;;  %2582 = vmatprep.subr.mxu1 %v2831_v5 }
 0x1e3   : > { %2443 = vmatpush3.msra.mxu0 %v3141_v56 }
 0x1e4   : > { %2444 = vmatprep.subr.mxu0 %v3145_v11 }
 0x1e5   : > { %2445 = vmatpush3.msra.mxu0 %v3145_v11 }
 0x1e6   : > { %2446 = vmatprep.subr.mxu0 %v636_v10 }
 0x1e7   : > { %2447 = vmatpush3.msra.mxu0 %v636_v10 }
 0x1e8   : > { %2449 = vmatmul.mubr.msk.f32.vlgmr.msra.gmra.mxu0 %vm640_vm2, %v3154_v9  ;;  %2454 = vmatprep.subr.mxu0 %v3139_v54 }
 0x1e9   : > { %2455 = vmatpush3.msra.mxu0 %v3139_v54  ;;  %2451 = vmatprep.mubr.msk.f32.mxu0 %vm640_vm2, %v3159_v12 }
 0x1ea   : > { %2456 = vmatprep.subr.mxu0 %v3141_v56 }
 0x1eb   : > { %2457 = vmatpush3.msra.mxu0 %v3141_v56 }
 0x1ec   : > { %2452 = vmatmul.mubr.msk.f32.gmra.mxu0 %vm640_vm2, %v3170_v57  ;;  %2458 = vmatprep.subr.mxu0 %v3145_v11 }
 0x1ed   : > { %2459 = vmatpush3.msra.mxu0 %v3145_v11  ;;  %2462 = vmatprep.mubr.msk.f32.mxu0 %vm640_vm2, %v3176_v59 }
 0x1ee   : > { %2460 = vmatprep.subr.mxu0 %v636_v10 }
 0x1ef   : > { %2461 = vmatpush3.msra.mxu0 %v636_v10 }
 0x1f0   : > { %2463 = vmatmul.mubr.msk.f32.vlgmr.msra.gmra.mxu0 %vm640_vm2, %v3188_v60  ;;  %2468 = vmatprep.subr.mxu0 %v2055_v61 }
 0x1f1   : > { %2469 = vmatpush3.msra.mxu0 %v2055_v61  ;;  %2465 = vmatprep.mubr.msk.f32.mxu0 %vm640_vm2, %v3194_v62 }
 0x1f2   : > { %2470 = vmatprep.subr.mxu0 %v2054_v63 }
 0x1f3   : > { %2471 = vmatpush3.msra.mxu0 %v2054_v63 }
 0x1f4   : > { %2466 = vmatmul.mubr.msk.f32.gmra.mxu0 %vm640_vm2, %v3204_v0  ;;  %2472 = vmatprep.subr.mxu0 %v2053_v2 }
 0x1f5   : > { %2473 = vmatpush3.msra.mxu0 %v2053_v2  ;;  %2500 = vmatprep.mubr.f32.mxu0 %v636_v10 }
 0x1f6   : > { %2474 = vmatprep.subr.mxu0 %v2052_v3 }
 0x1f7   : > { %2475 = vmatpush3.msra.mxu0 %v2052_v3 }
 0x1f8   : > { %2476 = vmatprep.subr.mxu0 %v2051_v13 }
 0x1f9   : > { %2477 = vmatpush3.msra.mxu0 %v2051_v13 }
 0x1fa   : > { %2478 = vmatprep.subr.mxu0 %v2050_v14 }
 0x1fb   : > { %2479 = vmatpush3.msra.mxu0 %v2050_v14 }
 0x1fc   : > { %2480 = vmatprep.subr.mxu0 %v2049_v15 }
 0x1fd   : > { %2481 = vmatpush3.msra.mxu0 %v2049_v15 }
 0x1fe   : > { %2482 = vmatprep.subr.mxu0 %v2048_v17 }
 0x1ff   : > { %2483 = vmatpush3.msra.mxu0 %v2048_v17 }
 0x200   : > { %2484 = vmatprep.subr.mxu0 %v2047_v18 }
 0x201   : > { %2485 = vmatpush3.msra.mxu0 %v2047_v18 }
 0x202   : > { %2486 = vmatprep.subr.mxu0 %v2046_v19 }
 0x203   : > { %2487 = vmatpush3.msra.mxu0 %v2046_v19 }
 0x204   : > { %2488 = vmatprep.subr.mxu0 %v2045_v20 }
 0x205   : > { %2489 = vmatpush3.msra.mxu0 %v2045_v20 }
 0x206   : > { %2490 = vmatprep.subr.mxu0 %v2044_v22 }
 0x207   : > { %2491 = vmatpush3.msra.mxu0 %v2044_v22 }
 0x208   : > { %2492 = vmatprep.subr.mxu0 %v2043_v23 }
 0x209   : > { %2493 = vmatpush3.msra.mxu0 %v2043_v23 }
 0x20a   : > { %2494 = vmatprep.subr.mxu0 %v2042_v25 }
 0x20b   : > { %2495 = vmatpush3.msra.mxu0 %v2042_v25 }
 0x20c   : > { %2496 = vmatprep.subr.mxu0 %v2041_v26 }
 0x20d   : > { %2497 = vmatpush3.msra.mxu0 %v2041_v26 }
 0x20e   : > { %2498 = vmatprep.subr.mxu0 %v2040_v28 }
 0x20f   : > { %2499 = vmatpush3.msra.mxu0 %v2040_v28 }
 0x210   : > { %2501 = vmatmul.mubr.f32.vlgmr.msra.gmra.mxu0 %v3145_v11  ;;  %2544 = vmatprep.subr.mxu0 %v2071_v29 }
 0x211   : > { %2503 = vmatprep.mubr.f32.mxu0 %v3141_v56  ;;  %2545 = vmatpush3.msra.mxu0 %v2071_v29  ;;  %v2056_v56 = vld [vmem:[%s2884_s7 + $0x100] sm:$0xff] }
 0x212   : > { %2546 = vmatprep.subr.mxu0 %v2070_v31 }
 0x213   : > { %2547 = vmatpush3.msra.mxu0 %v2070_v31 }
 0x214   : > { %2504 = vmatmul.mubr.f32.gmra.mxu0 %v3139_v54  ;;  %2548 = vmatprep.subr.mxu0 %v2069_v33  ;;  %v2058_v54 = vld [vmem:[%s2884_s7 + $0x110] sm:$0xff] }
 0x215   : > { %2549 = vmatpush3.msra.mxu0 %v2069_v33 }
 0x216   : > { %2550 = vmatprep.subr.mxu0 %v2068_v37 }
 0x217   : > { %2551 = vmatpush3.msra.mxu0 %v2068_v37 }
 0x218   : > { %2552 = vmatprep.subr.mxu0 %v2067_v38 }
 0x219   : > { %2553 = vmatpush3.msra.mxu0 %v2067_v38 }
 0x21a   : > { %2554 = vmatprep.subr.mxu0 %v2066_v41 }
 0x21b   : > { %2555 = vmatpush3.msra.mxu0 %v2066_v41 }
 0x21c   : > { %2556 = vmatprep.subr.mxu0 %v2065_v42 }
 0x21d   : > { %2557 = vmatpush3.msra.mxu0 %v2065_v42 }
 0x21e   : > { %2558 = vmatprep.subr.mxu0 %v2064_v45 }
 0x21f   : > { %2559 = vmatpush3.msra.mxu0 %v2064_v45 }
 0x220   : > { %2560 = vmatprep.subr.mxu0 %v2063_v46 }
 0x221   : > { %2561 = vmatpush3.msra.mxu0 %v2063_v46 }
 0x222   : > { %2562 = vmatprep.subr.mxu0 %v2062_v48 }
 0x223   : > { %2563 = vmatpush3.msra.mxu0 %v2062_v48 }
 0x224   : > { %2564 = vmatprep.subr.mxu0 %v2061_v50 }
 0x225   : > { %2565 = vmatpush3.msra.mxu0 %v2061_v50 }
 0x226   : > { %2566 = vmatprep.subr.mxu0 %v2060_v52 }
 0x227   : > { %2567 = vmatpush3.msra.mxu0 %v2060_v52 }
 0x228   : > { %2568 = vmatprep.subr.mxu0 %v2059_v53 }
 0x229   : > { %2569 = vmatpush3.msra.mxu0 %v2059_v53 }
 0x22a   : > { %2570 = vmatprep.subr.mxu0 %v2058_v54 }
 0x22b   : > { %2571 = vmatpush3.msra.mxu0 %v2058_v54 }
 0x22c   : > { %2572 = vmatprep.subr.mxu0 %v2057_v55 }
 0x22d   : > { %2573 = vmatpush3.msra.mxu0 %v2057_v55 }
 0x22e   : > { %2574 = vmatprep.subr.mxu0 %v2056_v56 }
 0x22f   : > { %2575 = vmatpush3.msra.mxu0 %v2056_v56 }
 0x230   : > { %2617 = vmatprep.subr.mxu0 %v2831_v5 }
 0x2a8   : > { %v2450_v11 = vpop.f32.mrf.mxu0 }
 0x2aa   : > { %v719_v10 = vpop.f32.mrf.mxu0 }
 0x2ab   : > { %2538 = vmatprep.mubr.f32.mxu1 %v719_v10 }
 0x2ac   : > { %v2453_v61 = vpop.f32.mrf.mxu0  ;;  %2539 = vmatmul.mubr.f32.vlgmr.msra.gmra.mxu1 %v2450_v11 }
 0x2ad   : > { %2583 = vmatpush3.msra.mxu1 %v2913_v4 }
 0x2ae   : > { %v729_v63 = vpop.f32.mrf.mxu0  ;;  %2584 = vmatprep.subr.mxu1 %v2831_v5 }
 0x2af   : > { %2541 = vmatprep.mubr.f32.mxu1 %v729_v63  ;;  %2585 = vmatpush3.msra.mxu1 %v2920_v6 }
 0x2b0   : > { %v2464_v2 = vpop.f32.mrf.mxu0  ;;  %2542 = vmatmul.mubr.f32.gmra.mxu1 %v2453_v61  ;;  %2586 = vmatprep.subr.mxu1 %v2831_v5 }
 0x2b1   : > { %2587 = vmatpush3.msra.mxu1 %v2929_v7  ;;  %2614 = vmatprep.mubr.msk.f32.mxu1 %vm2832_vm0, %v2831_v5 }
 0x2b2   : > { %v816_v3 = vpop.f32.mrf.mxu0  ;;  %2588 = vmatprep.subr.mxu1 %v2831_v5 }
 0x2b3   : > { %2576 = vmatprep.mubr.f32.mxu0 %v816_v3  ;;  %2589 = vmatpush3.msra.mxu1 %v2938_v8 }
 0x2b4   : > { %v2467_v13 = vpop.f32.mrf.mxu0  ;;  %2577 = vmatmul.mubr.f32.vlgmr.msra.gmra.mxu0 %v2464_v2  ;;  %2590 = vmatprep.subr.mxu1 %v2831_v5 }
 0x2b5   : > { %2618 = vmatpush3.msra.mxu0 %v2913_v4  ;;  %2591 = vmatpush3.msra.mxu1 %v2973_v16 }
 0x2b6   : > { %v826_v14 = vpop.f32.mrf.mxu0  ;;  %2619 = vmatprep.subr.mxu0 %v2831_v5  ;;  %2592 = vmatprep.subr.mxu1 %v2831_v5 }
 0x2b7   : > { %2579 = vmatprep.mubr.f32.mxu0 %v826_v14  ;;  %2620 = vmatpush3.msra.mxu0 %v2920_v6 }
 0x2b8   : > { %2580 = vmatmul.mubr.f32.gmra.mxu0 %v2467_v13  ;;  %2621 = vmatprep.subr.mxu0 %v2831_v5 }
 0x2b9   : > { %2622 = vmatpush3.msra.mxu0 %v2929_v7  ;;  %2593 = vmatpush3.msra.mxu1 %v2987_v21 }
 0x2ba   : > { %2623 = vmatprep.subr.mxu0 %v2831_v5  ;;  %2594 = vmatprep.subr.mxu1 %v2831_v5 }
 0x2bb   : > { %2624 = vmatpush3.msra.mxu0 %v2938_v8  ;;  %2595 = vmatpush3.msra.mxu1 %v2997_v24 }
 0x2bc   : > { %2625 = vmatprep.subr.mxu0 %v2831_v5  ;;  %2596 = vmatprep.subr.mxu1 %v2831_v5 }
 0x2bd   : > { %2626 = vmatpush3.msra.mxu0 %v2973_v16  ;;  %2597 = vmatpush3.msra.mxu1 %v3006_v27 }
 0x2be   : > { %2627 = vmatprep.subr.mxu0 %v2831_v5  ;;  %2598 = vmatprep.subr.mxu1 %v2831_v5 }
 0x2bf   : > { %2628 = vmatpush3.msra.mxu0 %v2987_v21  ;;  %2599 = vmatpush3.msra.mxu1 %v3015_v30 }
 0x2c0   : > { %2629 = vmatprep.subr.mxu0 %v2831_v5  ;;  %2600 = vmatprep.subr.mxu1 %v2831_v5 }
 0x2c1   : > { %2630 = vmatpush3.msra.mxu0 %v2997_v24  ;;  %2601 = vmatpush3.msra.mxu1 %v3024_v32 }
 0x2c2   : > { %2631 = vmatprep.subr.mxu0 %v2831_v5  ;;  %2602 = vmatprep.subr.mxu1 %v2831_v5 }
 0x2c3   : > { %2632 = vmatpush3.msra.mxu0 %v3006_v27  ;;  %2603 = vmatpush3.msra.mxu1 %v3033_v35 }
 0x2c4   : > { %2633 = vmatprep.subr.mxu0 %v2831_v5  ;;  %2604 = vmatprep.subr.mxu1 %v2831_v5 }
 0x2c5   : > { %2634 = vmatpush3.msra.mxu0 %v3015_v30  ;;  %2605 = vmatpush3.msra.mxu1 %v3042_v36 }
 0x2c6   : > { %2635 = vmatprep.subr.mxu0 %v2831_v5  ;;  %2606 = vmatprep.subr.mxu1 %v2831_v5 }
 0x2c7   : > { %2636 = vmatpush3.msra.mxu0 %v3024_v32  ;;  %2607 = vmatpush3.msra.mxu1 %v3051_v39 }
 0x2c8   : > { %2637 = vmatprep.subr.mxu0 %v2831_v5  ;;  %2608 = vmatprep.subr.mxu1 %v2831_v5 }
 0x2c9   : > { %2638 = vmatpush3.msra.mxu0 %v3033_v35  ;;  %2609 = vmatpush3.msra.mxu1 %v3060_v40 }
 0x2ca   : > { %2639 = vmatprep.subr.mxu0 %v2831_v5  ;;  %2610 = vmatprep.subr.mxu1 %v2831_v5 }
 0x2cb   : > { %2640 = vmatpush3.msra.mxu0 %v3042_v36  ;;  %2611 = vmatpush3.msra.mxu1 %v3069_v43 }
 0x2cc   : > { %2641 = vmatprep.subr.mxu0 %v2831_v5  ;;  %2612 = vmatprep.subr.mxu1 %v2831_v5 }
 0x2cd   : > { %2642 = vmatpush3.msra.mxu0 %v3051_v39  ;;  %2613 = vmatpush3.msra.mxu1 %v3078_v44 }
 0x2ce   : > { %2643 = vmatprep.subr.mxu0 %v2831_v5  ;;  %2649 = vmatprep.mubr.msk.f32.mxu0 %vm2832_vm0, %v2831_v5 }
 0x2cf   : > { %2644 = vmatpush3.msra.mxu0 %v3060_v40  ;;  %2652 = vmatprep.subr.mxu1 %v2831_v5 }
 0x2d0   : > { %2645 = vmatprep.subr.mxu0 %v2831_v5  ;;  %v2502_v4 = vpop.f32.mrf.mxu0 }
 0x2d1   : > { %2646 = vmatpush3.msra.mxu0 %v3069_v43 }
 0x2d2   : > { %2647 = vmatprep.subr.mxu0 %v2831_v5  ;;  %v934_v6 = vpop.f32.mrf.mxu0 }
 0x2d3   : > { %2648 = vmatpush3.msra.mxu0 %v3078_v44 }
 0x2d4   : > { %v2505_v8 = vpop.f32.mrf.mxu0 }
 0x2d6   : > { %v944_v21 = vpop.f32.mrf.mxu0 }
 0x36c   : > { %v2540_v7 = vpop.f32.mrf.mxu1 }
 0x36d   : > { %v1025_v30 = vadd.f32 %v2540_v7, %v2502_v4 }
 0x36e   : > { %v1019_v16 = vpop.f32.mrf.mxu1 }
 0x36f   : > { %v1020_v32 = vadd.f32 %v1019_v16, %v934_v6 }
 0x370   : > { %v2543_v24 = vpop.f32.mrf.mxu1 }
 0x371   : > { %v1035_v15 = vadd.f32 %v2543_v24, %v2505_v8 }
 0x372   : > { %v1029_v35 = vpop.f32.mrf.mxu1 }
 0x373   : > { %v1030_v17 = vadd.f32 %v1029_v35, %v944_v21  ;;  %v2092_v35 = vld [vmem:[%s2884_s7 + $0x1d0] sm:$0xff] }
 0x374   : > { %v2578_v27 = vpop.f32.mrf.mxu0 }
 0x375   : > { %v3312_v39 = vadd.f32 %v2578_v27, %v1025_v30  ;;  %v2097_v30 = vld [vmem:[%s2884_s7 + $0x1f8] sm:$0xff] }
 0x376   : > { %v1121_v36 = vpop.f32.mrf.mxu0  ;;  %2728 = vmatprep.subr.mxu0 %v2097_v30 }
 0x377   : > { %v3314_v40 = vadd.f32 %v1121_v36, %v1020_v32  ;;  %v1154_v19 = vmul.f32 %v3312_v39, %v3312_v39  ;;  %v2096_v32 = vld [vmem:[%s2884_s7 + $0x1f0] sm:$0xff]  ;;  %v2090_v36 = vld [vmem:[%s2884_s7 + $0x1c0] sm:$0xff] }
 0x378   : > { %v2581_v43 = vpop.f32.mrf.mxu0 }
 0x379   : > { %v1153_v44 = vmul.f32 %v3314_v40, %v3314_v40  ;;  %v1144_v20 = vadd.f32 %v3312_v39, %v3314_v40  ;;  %v3322_v22 = vadd.f32 %v2581_v43, %v1035_v15  ;;  %v2089_v43 = vld [vmem:[%s2884_s7 + $0x1b8] sm:$0xff]  ;;  %v2088_v15 = vld [vmem:[%s2884_s7 + $0x1b0] sm:$0xff] }
 0x37a   : > { %v1131_v18 = vpop.f32.mrf.mxu0 }
 0x37b   : > { %v3324_v23 = vadd.f32 %v1131_v18, %v1030_v17  ;;  %v1157_v25 = vadd.f32 %v1154_v19, %v1153_v44  ;;  %v1156_v29 = vmul.f32 %v3322_v22, %v3322_v22  ;;  %v2087_v17 = vld [vmem:[%s2884_s7 + $0x1a8] sm:$0xff]  ;;  %v2086_v44 = vld [vmem:[%s2884_s7 + $0x1a0] sm:$0xff]  ;;  %v2085_v18 = vld [vmem:[%s2884_s7 + $0x198] sm:$0xff] }
 0x37c   : > { %v2084_v19 = vld [vmem:[%s2884_s7 + $0x190] sm:$0xff] }
 0x37d   : > { %v1145_v26 = vadd.f32 %v1144_v20, %v3324_v23  ;;  %v1155_v28 = vmul.f32 %v3324_v23, %v3324_v23 }
 0x37f   : > { %v1146_v31 = vadd.f32 %v1145_v26, %v3322_v22  ;;  %v1158_v33 = vadd.f32 %v1157_v25, %v1155_v28 }
 0x381   : > { %v1147_v37 = vrot.slane %v1146_v31, 4  ;;  %v1159_v38 = vadd.f32 %v1158_v33, %v1156_v29 }
 0x383   : > { %v1148_v41 = vadd.f32 %v1147_v37, %v1146_v31  ;;  %v1160_v42 = vrot.slane %v1159_v38, 4 }
 0x385   : > { %v1149_v45 = vrot.slane %v1148_v41, 2  ;;  %v1161_v46 = vadd.f32 %v1160_v42, %v1159_v38 }
 0x387   : > { %v1150_v48 = vadd.f32 %v1149_v45, %v1148_v41  ;;  %v1162_v49 = vrot.slane %v1161_v46, 2 }
 0x389   : > { %v1151_v50 = vrot.slane %v1150_v48, 1  ;;  %v1163_v51 = vadd.f32 %v1162_v49, %v1161_v46 }
 0x38b   : > { %v1152_v52 = vadd.f32 %v1151_v50, %v1150_v48  ;;  %v1164_v53 = vrot.slane %v1163_v51, 1 }
 0x38d   : > { %2615 = vmatmul.mubr.f32.vlgmr.msra.gmra.mxu1 %v1152_v52  ;;  %v1165_v54 = vadd.f32 %v1164_v53, %v1163_v51  ;;  %v2103_v51 = vld [vmem:[%s2884_s7 + $0x228] sm:$0xff]  ;;  %v2102_v52 = vld [vmem:[%s2884_s7 + $0x220] sm:$0xff]  ;;  %v2101_v53 = vld [vmem:[%s2884_s7 + $0x218] sm:$0xff] }
 0x38e   : > { %2653 = vmatpush3.msra.mxu1 %v3096_v47  ;;  %2654 = vmatprep.mubr.msk.f32.mxu1 %vm2832_vm0, %v2831_v5 }
 0x38f   : > { %2650 = vmatmul.mubr.f32.vlgmr.msra.gmra.mxu0 %v1165_v54  ;;  %2657 = vmatprep.subr.mxu1 %v2831_v5  ;;  %v2100_v54 = vld [vmem:[%s2884_s7 + $0x210] sm:$0xff] }
 0x390   : > { %2729 = vmatpush3.msra.mxu0 %v2097_v30  ;;  %v2115_v30 = vld [vmem:[%s2884_s7 + $0x288] sm:$0xff] }
 0x391   : > { %2730 = vmatprep.subr.mxu0 %v2096_v32 }
 0x392   : > { %2731 = vmatpush3.msra.mxu0 %v2096_v32  ;;  %v2114_v32 = vld [vmem:[%s2884_s7 + $0x280] sm:$0xff] }
 0x44d   : > { %v1232_v55 = vpop.f32.mrf.mxu1 }
 0x44e   : > { %v1306_v56 = vmul.f32 0.001953125, %v1232_v55  ;;  %v2099_v55 = vld [vmem:[%s2884_s7 + $0x208] sm:$0xff] }
 0x44f   : > { %v2616_v11 = vpop.f32.mrf.mxu1  ;;  %v1302_v10 = vpop.f32.mrf.mxu0 }
 0x450   : > { %v1308_v61 = vmul.f32 %v1306_v56, %v1306_v56  ;;  %v1307_v63 = vmul.f32 0.001953125, %v1302_v10  ;;  %v2129_v11 = vld [vmem:[%s2884_s7 + $0x2f8] sm:$0xff]  ;;  %v2128_v10 = vld [vmem:[%s2884_s7 + $0x2f0] sm:$0xff] }
 0x451   : > { %v2651_v2 = vpop.f32.mrf.mxu0 }
 0x452   : > { %v1309_v3 = vsub.f32 %v1307_v63, %v1308_v61  ;;  %v2127_v61 = vld [vmem:[%s2884_s7 + $0x2e8] sm:$0xff]  ;;  %v2126_v63 = vld [vmem:[%s2884_s7 + $0x2e0] sm:$0xff]  ;;  %v2125_v2 = vld [vmem:[%s2884_s7 + $0x2d8] sm:$0xff] }
 0x454   : > { %v1310_v13 = vmax.f32 %v1309_v3, 0.0  ;;  %v2124_v3 = vld [vmem:[%s2884_s7 + $0x2d0] sm:$0xff] }
 0x456   : > { %v1311_v14 = vadd.f32 1e-05, %v1310_v13  ;;  %v2123_v13 = vld [vmem:[%s2884_s7 + $0x2c8] sm:$0xff] }
 0x458   : > { %2817 = vrsqrt.f32 %v1311_v14  ;;  %v2122_v14 = vld [vmem:[%s2884_s7 + $0x2c0] sm:$0xff] }
 0x465   : > { %v2818_v4 = vpop.eup %2817 }
 0x466   : > { %v1314_v6 = vrot.slane %v2818_v4, 6  ;;  %v2121_v4 = vld [vmem:[%s2884_s7 + $0x2b8] sm:$0xff] }
 0x468   : > { %v1316_v7 = vmul.f32 %v1314_v6, %v3101_v58  ;;  %v2120_v6 = vld [vmem:[%s2884_s7 + $0x2b0] sm:$0xff] }
 0x46a   : > { %v1318_v8 = vrot.slane %v1316_v7, 2  ;;  %v2083_v7 = vld [vmem:[%s2884_s7 + $0x188] sm:$0xff] }
 0x46c   : > { %v1320_v16 = vmul.f32 %v1318_v8, %v1306_v56  ;;  %2655 = vmatmul.mubr.msk.f32.vlgmr.msra.gmra.mxu1 %vm472_vm1, %v1318_v8  ;;  %v2098_v56 = vld [vmem:[%s2884_s7 + $0x200] sm:$0xff]  ;;  %v2119_v8 = vld [vmem:[%s2884_s7 + $0x2a8] sm:$0xff] }
 0x46d   : > { %2658 = vmatpush3.msra.mxu1 %v3096_v47  ;;  %2659 = vmatprep.mubr.msk.f32.mxu1 %vm2832_vm0, %v2831_v5  ;;  %v2095_v47 = vld [vmem:[%s2884_s7 + $0x1e8] sm:$0xff]  ;;  %v2094_v5 = vld [vmem:[%s2884_s7 + $0x1e0] sm:$0xff] }
 0x46e   : > { %v1322_v21 = vrot.slane %v1320_v16, 5  ;;  %2732 = vmatprep.subr.mxu0 %v2095_v47  ;;  %v2082_v16 = vld [vmem:[%s2884_s7 + $0x180] sm:$0xff] }
 0x46f   : > { %2733 = vmatpush3.msra.mxu0 %v2095_v47 }
 0x470   : > { %v1324_v24 = vsub.f32 %v3101_v58, %v1322_v21  ;;  %v2093_v58 = vld [vmem:[%s2884_s7 + $0x1d8] sm:$0xff]  ;;  %2734 = vmatprep.subr.mxu0 %v2094_v5  ;;  %v2118_v21 = vld [vmem:[%s2884_s7 + $0x2a0] sm:$0xff] }
 0x471   : > { %2735 = vmatpush3.msra.mxu0 %v2094_v5 }
 0x472   : > { %v1398_v27 = vrot.slane %v1324_v24, 3  ;;  %2736 = vmatprep.subr.mxu0 %v2093_v58  ;;  %v2117_v24 = vld [vmem:[%s2884_s7 + $0x298] sm:$0xff] }
 0x473   : > { %2737 = vmatpush3.msra.mxu0 %v2093_v58 }
 0x474   : > { %2660 = vmatmul.mubr.msk.f32.vlgmr.msra.gmra.mxu1 %vm472_vm1, %v1398_v27  ;;  %2738 = vmatprep.subr.mxu0 %v2092_v35  ;;  %v2116_v27 = vld [vmem:[%s2884_s7 + $0x290] sm:$0xff] }
 0x475   : > { %2670 = vmatprep.mubr.msk.f32.mxu1 %vm640_vm2, %v3113_v1  ;;  %v2091_v1 = vld [vmem:[%s2884_s7 + $0x1c8] sm:$0xff]  ;;  %2739 = vmatpush3.msra.mxu0 %v2092_v35 }
 0x476   : > { %2740 = vmatprep.subr.mxu0 %v2091_v1 }
 0x477   : > { %2741 = vmatpush3.msra.mxu0 %v2091_v1 }
 0x478   : > { %2742 = vmatprep.subr.mxu0 %v2090_v36 }
 0x479   : > { %2743 = vmatpush3.msra.mxu0 %v2090_v36 }
 0x47a   : > { %2744 = vmatprep.subr.mxu0 %v2089_v43 }
 0x47b   : > { %2745 = vmatpush3.msra.mxu0 %v2089_v43 }
 0x47c   : > { %2746 = vmatprep.subr.mxu0 %v2088_v15 }
 0x47d   : > { %2747 = vmatpush3.msra.mxu0 %v2088_v15 }
 0x47e   : > { %2748 = vmatprep.subr.mxu0 %v2087_v17 }
 0x47f   : > { %2749 = vmatpush3.msra.mxu0 %v2087_v17 }
 0x480   : > { %2750 = vmatprep.subr.mxu0 %v2086_v44 }
 0x481   : > { %2751 = vmatpush3.msra.mxu0 %v2086_v44 }
 0x482   : > { %2752 = vmatprep.subr.mxu0 %v2085_v18 }
 0x483   : > { %2753 = vmatpush3.msra.mxu0 %v2085_v18 }
 0x484   : > { %2754 = vmatprep.subr.mxu0 %v2084_v19 }
 0x485   : > { %2755 = vmatpush3.msra.mxu0 %v2084_v19 }
 0x486   : > { %2756 = vmatprep.subr.mxu0 %v2083_v7 }
 0x487   : > { %2757 = vmatpush3.msra.mxu0 %v2083_v7 }
 0x488   : > { %2758 = vmatprep.subr.mxu0 %v2082_v16 }
 0x489   : > { %2759 = vmatpush3.msra.mxu0 %v2082_v16 }
 0x52c   : > { %v1393_v20 = vpop.f32.mrf.mxu1 }
 0x52d   : > { %v1474_v26 = vrot.slane %v1393_v20, %v3131_v34 }
 0x52e   : > { %v2656_v25 = vpop.f32.mrf.mxu1 }
 0x52f   : > { %v1477_v29 = vmul.f32 %v1474_v26, %v3324_v23  ;;  %v1478_v31 = vmul.f32 %v1474_v26, %v3322_v22  ;;  %v1476_v38 = vmul.f32 %v1474_v26, %v3312_v39  ;;  %v1475_v45 = vmul.f32 %v1474_v26, %v3314_v40  ;;  %v2108_v39 = vld [vmem:[%s2884_s7 + $0x250] sm:$0xff]  ;;  %v2106_v40 = vld [vmem:[%s2884_s7 + $0x240] sm:$0xff] }
 0x530   : > { %v2104_v23 = vld [vmem:[%s2884_s7 + $0x230] sm:$0xff] }
 0x534   : > { %v1467_v28 = vpop.f32.mrf.mxu1 }
 0x535   : > { %v1482_v33 = vrot.slane %v1467_v28, %v3131_v34 }
 0x536   : > { %v2661_v37 = vpop.f32.mrf.mxu1 }
 0x537   : > { %v1485_v41 = vadd.f32 %v1482_v33, %v1477_v29  ;;  %v1486_v42 = vadd.f32 %v1482_v33, %v1478_v31  ;;  %v1484_v46 = vadd.f32 %v1482_v33, %v1476_v38  ;;  %v1483_v49 = vadd.f32 %v1482_v33, %v1475_v45 }
 0x539   : > { %v3365_v48 = vmax.f32 %v1486_v42, 0.0  ;;  %v3367_v50 = vmax.f32 %v1485_v41, 0.0  ;;  %v3371_v22 = vmax.f32 %v1484_v46, 0.0  ;;  %v1487_v34 = vmax.f32 %v1483_v49, 0.0  ;;  %v2819_v42 = vld [vmem:[%s3467_s6 + $0x8] sm:$0xff] }
 0x53b   : > { %2662 = vmatprep.subr.mxu1 %v3365_v48 }
 0x53c   : > { %2663 = vmatpush3.msra.mxu1 %v3365_v48 }
 0x53d   : > { %2664 = vmatprep.subr.mxu1 %v3367_v50 }
 0x53e   : > { %2665 = vmatpush3.msra.mxu1 %v3367_v50 }
 0x53f   : > { %2666 = vmatprep.subr.mxu1 %v3371_v22 }
 0x540   : > { %2667 = vmatpush3.msra.mxu1 %v3371_v22 }
 0x541   : > { %2668 = vmatprep.subr.mxu1 %v1487_v34 }
 0x542   : > { %2669 = vmatpush3.msra.mxu1 %v1487_v34 }
 0x543   : > { %2671 = vmatmul.mubr.msk.f32.vlgmr.msra.gmra.mxu1 %vm640_vm2, %v3154_v9  ;;  %2676 = vmatprep.subr.mxu1 %v3365_v48  ;;  %v2113_v9 = vld [vmem:[%s2884_s7 + $0x278] sm:$0xff] }
 0x544   : > { %2677 = vmatpush3.msra.mxu1 %v3365_v48  ;;  %2673 = vmatprep.mubr.msk.f32.mxu1 %vm640_vm2, %v3159_v12  ;;  %v2112_v12 = vld [vmem:[%s2884_s7 + $0x270] sm:$0xff] }
 0x545   : > { %2678 = vmatprep.subr.mxu1 %v3367_v50 }
 0x546   : > { %2679 = vmatpush3.msra.mxu1 %v3367_v50 }
 0x547   : > { %2674 = vmatmul.mubr.msk.f32.gmra.mxu1 %vm640_vm2, %v3170_v57  ;;  %2680 = vmatprep.subr.mxu1 %v3371_v22  ;;  %v2111_v57 = vld [vmem:[%s2884_s7 + $0x268] sm:$0xff] }
 0x548   : > { %2681 = vmatpush3.msra.mxu1 %v3371_v22  ;;  %2684 = vmatprep.mubr.msk.f32.mxu1 %vm640_vm2, %v3176_v59  ;;  %v2110_v59 = vld [vmem:[%s2884_s7 + $0x260] sm:$0xff] }
 0x549   : > { %2682 = vmatprep.subr.mxu1 %v1487_v34 }
 0x54a   : > { %2683 = vmatpush3.msra.mxu1 %v1487_v34 }
 0x54b   : > { %2685 = vmatmul.mubr.msk.f32.vlgmr.msra.gmra.mxu1 %vm640_vm2, %v3188_v60  ;;  %2690 = vmatprep.subr.mxu1 %v2113_v9  ;;  %v2109_v60 = vld [vmem:[%s2884_s7 + $0x258] sm:$0xff] }
 0x54c   : > { %2691 = vmatpush3.msra.mxu1 %v2113_v9  ;;  %2687 = vmatprep.mubr.msk.f32.mxu1 %vm640_vm2, %v3194_v62  ;;  %v2107_v62 = vld [vmem:[%s2884_s7 + $0x248] sm:$0xff] }
 0x54d   : > { %2692 = vmatprep.subr.mxu1 %v2112_v12 }
 0x54e   : > { %2693 = vmatpush3.msra.mxu1 %v2112_v12  ;;  %v2821_v12 = vld [vmem:[%s3467_s6 + $0x18] sm:$0xff] }
 0x54f   : > { %2688 = vmatmul.mubr.msk.f32.gmra.mxu1 %vm640_vm2, %v3204_v0  ;;  %2694 = vmatprep.subr.mxu1 %v2111_v57  ;;  %v2105_v0 = vld [vmem:[%s2884_s7 + $0x238] sm:$0xff] }
 0x550   : > { %2695 = vmatpush3.msra.mxu1 %v2111_v57  ;;  %2722 = vmatprep.mubr.f32.mxu1 %v1487_v34 }
 0x551   : > { %2696 = vmatprep.subr.mxu1 %v2110_v59 }
 0x552   : > { %2697 = vmatpush3.msra.mxu1 %v2110_v59 }
 0x553   : > { %2698 = vmatprep.subr.mxu1 %v2109_v60 }
 0x554   : > { %2699 = vmatpush3.msra.mxu1 %v2109_v60  ;;  %v2822_v60 = vld [vmem:[%s3467_s6 + $0x10] sm:$0xff] }
 0x555   : > { %2700 = vmatprep.subr.mxu1 %v2108_v39 }
 0x556   : > { %2701 = vmatpush3.msra.mxu1 %v2108_v39 }
 0x557   : > { %2702 = vmatprep.subr.mxu1 %v2107_v62 }
 0x558   : > { %2703 = vmatpush3.msra.mxu1 %v2107_v62 }
 0x559   : > { %2704 = vmatprep.subr.mxu1 %v2106_v40 }
 0x55a   : > { %2705 = vmatpush3.msra.mxu1 %v2106_v40 }
 0x55b   : > { %2706 = vmatprep.subr.mxu1 %v2105_v0 }
 0x55c   : > { %2707 = vmatpush3.msra.mxu1 %v2105_v0 }
 0x55d   : > { %2708 = vmatprep.subr.mxu1 %v2104_v23 }
 0x55e   : > { %2709 = vmatpush3.msra.mxu1 %v2104_v23 }
 0x55f   : > { %2710 = vmatprep.subr.mxu1 %v2103_v51 }
 0x560   : > { %2711 = vmatpush3.msra.mxu1 %v2103_v51 }
 0x561   : > { %2712 = vmatprep.subr.mxu1 %v2102_v52 }
 0x562   : > { %2713 = vmatpush3.msra.mxu1 %v2102_v52 }
 0x563   : > { %2714 = vmatprep.subr.mxu1 %v2101_v53 }
 0x564   : > { %2715 = vmatpush3.msra.mxu1 %v2101_v53 }
 0x565   : > { %2716 = vmatprep.subr.mxu1 %v2100_v54 }
 0x566   : > { %2717 = vmatpush3.msra.mxu1 %v2100_v54 }
 0x567   : > { %2718 = vmatprep.subr.mxu1 %v2099_v55 }
 0x568   : > { %2719 = vmatpush3.msra.mxu1 %v2099_v55 }
 0x569   : > { %2720 = vmatprep.subr.mxu1 %v2098_v56 }
 0x56a   : > { %2721 = vmatpush3.msra.mxu1 %v2098_v56 }
 0x56b   : > { %2723 = vmatmul.mubr.f32.vlgmr.msra.gmra.mxu1 %v3371_v22  ;;  %2766 = vmatprep.subr.mxu1 %v2129_v11 }
 0x56c   : > { %2725 = vmatprep.mubr.f32.mxu1 %v3367_v50  ;;  %2767 = vmatpush3.msra.mxu1 %v2129_v11  ;;  %v2820_v50 = vld [vmem:[%s3467_s6] sm:$0xff] }
 0x56d   : > { %2768 = vmatprep.subr.mxu1 %v2128_v10 }
 0x56e   : > { %2769 = vmatpush3.msra.mxu1 %v2128_v10 }
 0x56f   : > { %2726 = vmatmul.mubr.f32.gmra.mxu1 %v3365_v48  ;;  %2770 = vmatprep.subr.mxu1 %v2127_v61 }
 0x570   : > { %2771 = vmatpush3.msra.mxu1 %v2127_v61 }
 0x571   : > { %2772 = vmatprep.subr.mxu1 %v2126_v63 }
 0x572   : > { %2773 = vmatpush3.msra.mxu1 %v2126_v63 }
 0x573   : > { %2774 = vmatprep.subr.mxu1 %v2125_v2 }
 0x574   : > { %2775 = vmatpush3.msra.mxu1 %v2125_v2 }
 0x575   : > { %2776 = vmatprep.subr.mxu1 %v2124_v3 }
 0x576   : > { %2777 = vmatpush3.msra.mxu1 %v2124_v3 }
 0x577   : > { %2778 = vmatprep.subr.mxu1 %v2123_v13 }
 0x578   : > { %2779 = vmatpush3.msra.mxu1 %v2123_v13 }
 0x579   : > { %2780 = vmatprep.subr.mxu1 %v2122_v14 }
 0x57a   : > { %2781 = vmatpush3.msra.mxu1 %v2122_v14 }
 0x57b   : > { %2782 = vmatprep.subr.mxu1 %v2121_v4 }
 0x57c   : > { %2783 = vmatpush3.msra.mxu1 %v2121_v4 }
 0x57d   : > { %2784 = vmatprep.subr.mxu1 %v2120_v6 }
 0x57e   : > { %2785 = vmatpush3.msra.mxu1 %v2120_v6 }
 0x57f   : > { %2786 = vmatprep.subr.mxu1 %v2119_v8 }
 0x580   : > { %2787 = vmatpush3.msra.mxu1 %v2119_v8 }
 0x581   : > { %2788 = vmatprep.subr.mxu1 %v2118_v21 }
 0x582   : > { %2789 = vmatpush3.msra.mxu1 %v2118_v21 }
 0x583   : > { %2790 = vmatprep.subr.mxu1 %v2117_v24 }
 0x584   : > { %2791 = vmatpush3.msra.mxu1 %v2117_v24 }
 0x585   : > { %2792 = vmatprep.subr.mxu1 %v2116_v27 }
 0x586   : > { %2793 = vmatpush3.msra.mxu1 %v2116_v27 }
 0x587   : > { %2794 = vmatprep.subr.mxu1 %v2115_v30 }
 0x588   : > { %2795 = vmatpush3.msra.mxu1 %v2115_v30 }
 0x589   : > { %2796 = vmatprep.subr.mxu1 %v2114_v32 }
 0x58a   : > { %2797 = vmatpush3.msra.mxu1 %v2114_v32 }
 0x603   : > { %v2672_v47 = vpop.f32.mrf.mxu1 }
 0x605   : > { %v1557_v5 = vpop.f32.mrf.mxu1 }
 0x606   : > { %2760 = vmatprep.mubr.f32.mxu0 %v1557_v5 }
 0x607   : > { %v2675_v58 = vpop.f32.mrf.mxu1  ;;  %2761 = vmatmul.mubr.f32.vlgmr.msra.gmra.mxu0 %v2672_v47 }
 0x609   : > { %v1567_v35 = vpop.f32.mrf.mxu1 }
 0x60a   : > { %2763 = vmatprep.mubr.f32.mxu0 %v1567_v35 }
 0x60b   : > { %v2686_v1 = vpop.f32.mrf.mxu1  ;;  %2764 = vmatmul.mubr.f32.gmra.mxu0 %v2675_v58 }
 0x60d   : > { %v1642_v36 = vpop.f32.mrf.mxu1 }
 0x60e   : > { %2798 = vmatprep.mubr.f32.mxu1 %v1642_v36 }
 0x60f   : > { %v2689_v43 = vpop.f32.mrf.mxu1  ;;  %2799 = vmatmul.mubr.f32.vlgmr.msra.gmra.mxu1 %v2686_v1 }
 0x611   : > { %v1652_v15 = vpop.f32.mrf.mxu1 }
 0x612   : > { %2801 = vmatprep.mubr.f32.mxu1 %v1652_v15 }
 0x613   : > { %2802 = vmatmul.mubr.f32.gmra.mxu1 %v2689_v43 }
 0x62b   : > { %v2724_v17 = vpop.f32.mrf.mxu1 }
 0x62d   : > { %v1761_v44 = vpop.f32.mrf.mxu1 }
 0x62f   : > { %v2727_v19 = vpop.f32.mrf.mxu1 }
 0x631   : > { %v1771_v25 = vpop.f32.mrf.mxu1 }
 0x6c7   : > { %v2762_v18 = vpop.f32.mrf.mxu0 }
 0x6c8   : > { %v1852_v28 = vadd.f32 %v2762_v18, %v2724_v17 }
 0x6c9   : > { %v1846_v20 = vpop.f32.mrf.mxu0 }
 0x6ca   : > { %v1847_v31 = vadd.f32 %v1846_v20, %v1761_v44 }
 0x6cb   : > { %v2765_v26 = vpop.f32.mrf.mxu0 }
 0x6cc   : > { %v1862_v41 = vadd.f32 %v2765_v26, %v2727_v19 }
 0x6cd   : > { %v1856_v37 = vpop.f32.mrf.mxu0 }
 0x6ce   : > { %v1857_v49 = vadd.f32 %v1856_v37, %v1771_v25 }
 0x6cf   : > { %v2800_v29 = vpop.f32.mrf.mxu1 }
 0x6d0   : > { %v1968_v33 = vadd.f32 %v2800_v29, %v1852_v28 }
 0x6d1   : > { %v1948_v38 = vpop.f32.mrf.mxu1 }
 0x6d2   : > { %v1972_v45 = vadd.f32 %v2819_v42, %v1968_v33  ;;  %v1967_v46 = vadd.f32 %v1948_v38, %v1847_v31 }
 0x6d3   : > { %v2803_v48 = vpop.f32.mrf.mxu1 }
 0x6d4   : > { %1976 = vst [vmem:[%s3467_s6 + $0x8] sm:$0xff] %v1972_v45  ;;  %v1971_v22 = vadd.f32 %v2820_v50, %v1967_v46  ;;  %v1970_v34 = vadd.f32 %v2803_v48, %v1862_v41 }
 0x6d5   : > { %v1958_v9 = vpop.f32.mrf.mxu1 }
 0x6d6   : > { %1975 = vst [vmem:[%s3467_s6] sm:$0xff] %v1971_v22  ;;  %v1974_v57 = vadd.f32 %v2821_v12, %v1970_v34  ;;  %v1969_v59 = vadd.f32 %v1958_v9, %v1857_v49 }
 0x6d8   : > { %1978 = vst [vmem:[%s3467_s6 + $0x18] sm:$0xff] %v1974_v57  ;;  %v1973_v39 = vadd.f32 %v2822_v60, %v1969_v59 }
 0x6da   : > { %1977 = vst [vmem:[%s3467_s6 + $0x10] sm:$0xff] %v1973_v39 }
 0x6db PF: > { %s16_s21 = sadd.s32 1, %s2829_s21  }
 0x6dc   : > { %p13_p5 = scmp.ge.s32.totalorder %s16_s21, 4  }
 0x6de   :  { %15 = sbr.rel (!%p13_p5) target bundleno = 1 (0x1), region = 83 }

</bundles_post_ra>
